<compile_context>
chip_gen: v7x
topology: tpu7x:2x2x1
jax: 0.10.0
libtpu: 0.0.40
codegen_flags: <defaults>
</compile_context>

<pallas_src>
from functools import partial

import jax
import jax.numpy as jnp
from jax import lax
from jax.experimental import pallas as pl
from jax.experimental.pallas import tpu as pltpu

CLS = 1  # number of cls tokens (module default)


# ----------------------------- small helpers --------------------------------

def _round_up(v, m):
    return ((v + m - 1) // m) * m


def _pad_last(a, to):
    pad = to - a.shape[-1]
    if pad == 0:
        return a
    cfg = [(0, 0)] * (a.ndim - 1) + [(0, pad)]
    return jnp.pad(a, cfg)


def _pad2(a, rows, cols):
    return jnp.pad(a, ((0, rows - a.shape[0]), (0, cols - a.shape[1])))


def _pick_block_b(B, requested=None):
    if requested is not None:
        if B % requested:
            raise ValueError("block_b must divide B")
        return requested
    # grid >= 2 whenever possible (v7x megacore) while keeping blocks decently big.
    # TODO(synk): per-generation tuning — v6e (1 TC, 128 MiB VMEM) prefers block_b=8-16.
    target = max(1, min(8, B // 2))
    for bb in range(target, 0, -1):
        if B % bb == 0:
            return bb
    return 1


def _pick_mlp_tile(m_rows, target=512):
    """Largest divisor of m_rows <= target (prefer multiples of 8)."""
    if m_rows <= target:
        return m_rows
    fallback = None
    for t in range(target, 0, -1):
        if m_rows % t == 0:
            if t % 8 == 0:
                return t
            if fallback is None:
                fallback = t
    return fallback if fallback is not None else m_rows


def _softmax(v):
    m = jnp.max(v, axis=-1, keepdims=True)
    e = jnp.exp(v - m)
    s = jnp.sum(e, axis=-1, keepdims=True)
    return e * pl.reciprocal(s, approx=True)      # divide -> EUP vrcp


def _gelu_tanh(v):
    # tanh-approx GELU (single EUP op instead of a ~10-op polynomial erf on the VALU).
    c = 0.7978845608028654  # sqrt(2/pi)
    return 0.5 * v * (1.0 + jnp.tanh(c * (v + 0.044715 * (v * v * v))))


# --------------------------------- kernel -----------------------------------

def _dcr_kernel(scal_ref, x_p_ref, y_p_ref, pos_ref,
                wqkT_ref, w1x_ref, w1y_ref, b1_ref, w2_ref, b2_ref,
                delta_ref, k_scr, crs_scr, hmap_scr,
                *, n_batch, n_patch, mlp_tile):
    f32, bf16 = jnp.float32, jnp.bfloat16
    sig_g = scal_ref[0]      # sigmoid(gating), precomputed
    h_temp = scal_ref[1]
    scale = scal_ref[2]
    P = n_patch

    # qk projection fused over all block rows (one big MXU matmul, M = n_batch*P);
    # parked in bf16 scratch so nothing large stays live across the loops below.
    k_scr[...] = jnp.dot(y_p_ref[...], wqkT_ref[...],
                         preferred_element_type=f32).astype(bf16)

    pos = pos_ref[...]                                       # (P, P) f32, precomputed

    # Cross attention is block-diagonal over the batch -> per-batch on the MXU.
    # TODO(synk): for tiny P (<=64) a single block-diagonal-masked matmul would use
    # the MXU/lanes better; skipped to keep the kernel shape-agnostic.
    def attn_body(b, carry):
        r0 = pl.multiple_of(b * P, P)
        q_b = x_p_ref[pl.ds(r0, P), :]                       # (P, Dp) bf16
        k_b = k_scr[pl.ds(r0, P), :]                         # (P, Dp) bf16
        v_b = y_p_ref[pl.ds(r0, P), :]                       # (P, Dp) bf16

        s = lax.dot_general(q_b, k_b, (((1,), (1,)), ((), ())),
                            preferred_element_type=f32) * scale      # (P, P) f32
        patch_score = _softmax(s)
        attn = (1.0 - sig_g) * patch_score + sig_g * pos             # (P, P) f32

        crs_scr[pl.ds(r0, P), :] = jnp.dot(
            attn.astype(bf16), v_b, preferred_element_type=f32).astype(bf16)
        entropy = jnp.sum(-attn * jnp.log(attn + 1e-8), axis=-1, keepdims=True)
        hmap_scr[pl.ds(r0, P), :] = 2.0 * (1.0 - jax.nn.sigmoid(h_temp * entropy))
        return carry

    lax.fori_loop(0, n_batch, attn_body, None, unroll=True)

    # proj MLP tiled over row chunks so the (rows, d_ff) f32 intermediate stays small.
    n_tiles = (n_batch * P) // mlp_tile

    def mlp_body(t, carry):
        r0 = pl.multiple_of(t * mlp_tile, mlp_tile)
        x_t = x_p_ref[pl.ds(r0, mlp_tile), :]                # (T, Dp) bf16
        c_t = crs_scr[pl.ds(r0, mlp_tile), :]                # (T, Dp) bf16
        h = _gelu_tanh(jnp.dot(x_t, w1x_ref[...], preferred_element_type=f32)
                       + jnp.dot(c_t, w1y_ref[...], preferred_element_type=f32)
                       + b1_ref[...])                        # (T, Fp) f32
        proj = jnp.dot(h.astype(bf16), w2_ref[...],
                       preferred_element_type=f32) + b2_ref[...]      # (T, Dp) f32
        delta_ref[pl.ds(r0, mlp_tile), :] = (
            proj * hmap_scr[pl.ds(r0, mlp_tile), :]).astype(delta_ref.dtype)
        return carry

    lax.fori_loop(0, n_tiles, mlp_body, None)


# -------------------------------- wrapper ------------------------------------

def depth_cue_rectification_g(x, y, coords, params, block_b=None):
    Wqk, pos_emb, W1, b1, W2, b2, gating, h_temp, p_temp, scale = params
    B, N, D = x.shape
    P = N - CLS
    d_ff = W1.shape[0]
    f32, bf16 = jnp.float32, jnp.bfloat16

    Dp = _round_up(D, 128)       # lane-dense feature dim
    Fp = _round_up(d_ff, 128)    # lane-dense MLP hidden dim

    block_b = _pick_block_b(B, block_b)
    grid_b = B // block_b
    M_blk = block_b * P
    mlp_tile = _pick_mlp_tile(M_blk)

    x = x.astype(f32)
    y = y.astype(f32)

    # --- hoisted, batch-invariant position branch (plain JAX, f32) ---
    pos_logits = jnp.squeeze(coords.astype(f32) @ pos_emb.astype(f32), -1)   # (P, P)
    pos_score = jax.nn.softmax(-p_temp * pos_logits, axis=-1)                # (P, P)

    # --- patch slabs, zero-padded to Dp lanes, bf16 ---
    x_p2 = _pad_last(x[:, CLS:, :], Dp).reshape(B * P, Dp).astype(bf16)
    y_p2 = _pad_last(y[:, CLS:, :], Dp).reshape(B * P, Dp).astype(bf16)

    # --- weights: W1 split, transposed, zero-padded (padding is inert), bf16 ---
    w1x_f = W1[:, :D].T.astype(f32)        # (D, d_ff)
    w1y_f = W1[:, D:].T.astype(f32)        # (D, d_ff)
    w2_f = W2.T.astype(f32)                # (d_ff, D)
    b1_f = b1.astype(f32)
    b2_f = b2.astype(f32)

    wqkT = _pad2(Wqk.T.astype(f32), Dp, Dp).astype(bf16)
    w1x = _pad2(w1x_f, Dp, Fp).astype(bf16)
    w1y = _pad2(w1y_f, Dp, Fp).astype(bf16)
    b1r = _pad_last(b1_f.reshape(1, d_ff), Fp)
    w2t = _pad2(w2_f, Fp, Dp).astype(bf16)
    b2r = _pad_last(b2_f.reshape(1, D), Dp)

    scalars = jnp.array([jax.nn.sigmoid(gating), h_temp, scale], dtype=f32)

    # --- explicit VMEM budget (weights single-buffered, blocks double-buffered) ---
    bf2, f4 = 2, 4
    w_bytes = (Dp * Dp + 2 * Dp * Fp + Fp * Dp) * bf2 + (Fp + Dp) * f4 + P * P * f4
    io_bytes = 3 * (M_blk * Dp * bf2) * 2                 # x, y, delta blocks x2 bufs
    scr_bytes = 2 * (M_blk * Dp * bf2) + M_blk * f4       # k, crs, hmap scratch
    live_bytes = mlp_tile * Fp * f4 + 4 * P * P * f4      # MLP tile + attention temps
    need = io_bytes + 2 * w_bytes + scr_bytes + live_bytes
    vmem_limit = int(min(64 << 20, max(32 << 20, 2 * need)))

    kernel = partial(_dcr_kernel, n_batch=block_b, n_patch=P, mlp_tile=mlp_tile)

    def run(single_buffer):
        def const_spec(shape):
            n = len(shape)
            idx = lambda b, _n=n: (0,) * _n
            if single_buffer and hasattr(pl, "Buffered"):
                try:
                    # constant index across grid -> single buffer saves VMEM for free
                    return pl.BlockSpec(shape, idx, pipeline_mode=pl.Buffered(1))
                except TypeError:
                    pass
            return pl.BlockSpec(shape, idx)

        in_specs = [
            pl.BlockSpec(memory_space=pltpu.MemorySpace.SMEM),      # scalars
            pl.BlockSpec((M_blk, Dp), lambda b: (b, 0)),            # x patches
            pl.BlockSpec((M_blk, Dp), lambda b: (b, 0)),            # y patches
            const_spec((P, P)),                                     # pos_score
            const_spec((Dp, Dp)),                                   # Wqk^T
            const_spec((Dp, Fp)),                                   # W1x
            const_spec((Dp, Fp)),                                   # W1y
            const_spec((1, Fp)),                                    # b1
            const_spec((Fp, Dp)),                                   # W2^T
            const_spec((1, Dp)),                                    # b2
        ]
        return pl.pallas_call(
            kernel,
            grid=(grid_b,),
            in_specs=in_specs,
            out_specs=pl.BlockSpec((M_blk, Dp), lambda b: (b, 0)),
            out_shape=jax.ShapeDtypeStruct((B * P, Dp), bf16),      # delta only, bf16
            scratch_shapes=[pltpu.VMEM((M_blk, Dp), bf16),          # k projection
                            pltpu.VMEM((M_blk, Dp), bf16),          # crs (attn @ y)
                            pltpu.VMEM((M_blk, 1), f32)],           # heat map
            compiler_params=pltpu.CompilerParams(
                dimension_semantics=("parallel",),
                vmem_limit_bytes=vmem_limit),
        )(scalars, x_p2, y_p2, pos_score, wqkT, w1x, w1y, b1r, w2t, b2r)

    try:
        delta2 = run(single_buffer=True)
    except Exception:   # pragma: no cover — fallback if Buffered(1) is unsupported
        delta2 = run(single_buffer=False)

    # --- residual add in f32 in the wrapper (delta padding columns are zero) ---
    delta_p = delta2.reshape(B, P, Dp)[:, :, :D].astype(f32)
    out_patch = x[:, CLS:, :] + delta_p

    # --- cls tokens: tiny M, plain JAX (exact GELU, f32) ---
    x_c = x[:, :CLS, :]
    y_c = y[:, :CLS, :]
    h_c = jax.nn.gelu(x_c @ w1x_f + y_c @ w1y_f + b1_f, approximate=False)
    out_cls = x_c + (h_c @ w2_f + b2_f)

    return jnp.concatenate([out_cls, out_patch], axis=1)


# ------------------------------ reference ------------------------------------

def reference(x, y, coords, params):
    """Pure-JAX f32 transcription of the PyTorch forward (for validation)."""
    Wqk, pos_emb, W1, b1, W2, b2, gating, h_temp, p_temp, scale = params
    x_p = x[:, CLS:, :]
    y_cls = y[:, :CLS, :]
    y_p = y[:, CLS:, :]
    k = y_p @ Wqk.T
    patch_score = jax.nn.softmax(
        jnp.einsum('bqd,bkd->bqk', x_p, k) * scale, axis=-1)
    pos_logits = jnp.squeeze(coords @ pos_emb, -1)          # (P, P)
    pos_score = jax.nn.softmax(-p_temp * pos_logits, axis=-1)[None]
    g = jax.nn.sigmoid(gating)
    attn = (1.0 - g) * patch_score + g * pos_score
    crs = attn @ y_p
    entropy = jnp.sum(-attn * jnp.log(attn + 1e-8), axis=-1, keepdims=True)
    hmap = 2.0 * (1.0 - jax.nn.sigmoid(h_temp * entropy))
    y_new = jnp.concatenate([y_cls, crs], axis=1)
    cat = jnp.concatenate([x, y_new], axis=-1)
    h = jax.nn.gelu(cat @ W1.T + b1, approximate=False)
    xp = h @ W2.T + b2
    xp = jnp.concatenate([xp[:, :CLS, :], hmap * xp[:, CLS:, :]], axis=1)
    return x + xp


if __name__ == "__main__":
    B, dim, d_ff, P = 2, 32, 64, 16
    N = CLS + P

    key = jax.random.PRNGKey(0)
    ks = jax.random.split(key, 9)
    # deterministic synthetic parameter init (shapes match the nn.Module)
    Wqk = jax.random.normal(ks[0], (dim, dim), jnp.float32) * dim ** -0.5
    pos_emb = jax.random.truncated_normal(ks[1], 0.0, 1.0, (P, 6, 1)).astype(jnp.float32)
    W1 = jax.random.normal(ks[2], (d_ff, 2 * dim), jnp.float32) * (2 * dim) ** -0.5
    b1 = jax.random.normal(ks[3], (d_ff,), jnp.float32) * 0.02
    W2 = jax.random.normal(ks[4], (dim, d_ff), jnp.float32) * d_ff ** -0.5
    b2 = jax.random.normal(ks[5], (dim,), jnp.float32) * 0.02
    gating = jnp.float32(1.0)
    h_temp = jnp.float32(0.1)
    p_temp = jnp.float32(1.0)
    scale = jnp.float32(dim ** -0.5)          # a_temp=False
    params = (Wqk, pos_emb, W1, b1, W2, b2, gating, h_temp, p_temp, scale)

    x = jax.random.normal(ks[6], (B, N, dim), jnp.float32)
    y = jax.random.normal(ks[7], (B, N, dim), jnp.float32)
    coords = jax.random.normal(ks[8], (P, P, 6), jnp.float32)

    out = jax.block_until_ready(depth_cue_rectification_g(x, y, coords, params))

    ref = reference(x, y, coords, params)
    assert out.shape == (B, N, dim)
    # combined tolerance: bf16 MXU inputs + bf16 delta writeback + tanh-GELU +
    # approx reciprocal vs the exact-erf f32 reference
    assert bool(jnp.allclose(out, ref, atol=5e-2, rtol=5e-2)), "kernel/reference mismatch"
    print("KERNEL_OK")
</pallas_src>

<mosaic_0001>
module attributes {stable_mosaic.version = 11 : i64} {
  func.func @_dcr_kernel(%arg0: i32, %arg1: memref<3xf32, #tpu.memory_space<smem>>, %arg2: memref<16x128xbf16, #tpu.memory_space<vmem>>, %arg3: memref<16x128xbf16, #tpu.memory_space<vmem>>, %arg4: memref<16x16xf32, #tpu.memory_space<vmem>>, %arg5: memref<128x128xbf16, #tpu.memory_space<vmem>>, %arg6: memref<128x128xbf16, #tpu.memory_space<vmem>>, %arg7: memref<128x128xbf16, #tpu.memory_space<vmem>>, %arg8: memref<1x128xf32, #tpu.memory_space<vmem>>, %arg9: memref<128x128xbf16, #tpu.memory_space<vmem>>, %arg10: memref<1x128xf32, #tpu.memory_space<vmem>>, %arg11: memref<16x128xbf16, #tpu.memory_space<vmem>>, %arg12: memref<16x128xbf16, #tpu.memory_space<vmem>>, %arg13: memref<16x128xbf16, #tpu.memory_space<vmem>>, %arg14: memref<16x1xf32, #tpu.memory_space<vmem>>) attributes {dimension_semantics = [#tpu.dimension_semantics<parallel>], iteration_bounds = array<i64: 2>, scalar_prefetch = 0 : i64, scratch_operands = 3 : i64, tpu.core_type = #tpu.core_type<tc>, window_params = [{transform_indices = @transform_0, window_bounds = array<i64: 3>}, {transform_indices = @transform_1, window_bounds = array<i64: 16, 128>}, {transform_indices = @transform_2, window_bounds = array<i64: 16, 128>}, {pipeline_mode = #tpu.pipeline_mode<synchronous>, transform_indices = @transform_3, window_bounds = array<i64: 16, 16>}, {pipeline_mode = #tpu.pipeline_mode<synchronous>, transform_indices = @transform_4, window_bounds = array<i64: 128, 128>}, {pipeline_mode = #tpu.pipeline_mode<synchronous>, transform_indices = @transform_5, window_bounds = array<i64: 128, 128>}, {pipeline_mode = #tpu.pipeline_mode<synchronous>, transform_indices = @transform_6, window_bounds = array<i64: 128, 128>}, {pipeline_mode = #tpu.pipeline_mode<synchronous>, transform_indices = @transform_7, window_bounds = array<i64: 1, 128>}, {pipeline_mode = #tpu.pipeline_mode<synchronous>, transform_indices = @transform_8, window_bounds = array<i64: 128, 128>}, {pipeline_mode = #tpu.pipeline_mode<synchronous>, transform_indices = @transform_9, window_bounds = array<i64: 1, 128>}, {transform_indices = @transform_10, window_bounds = array<i64: 16, 128>}]} {
    %c0 = arith.constant 0 : index
    %0 = memref.load %arg1[%c0] : memref<3xf32, #tpu.memory_space<smem>>
    %c1 = arith.constant 1 : index
    %1 = memref.load %arg1[%c1] : memref<3xf32, #tpu.memory_space<smem>>
    %c2 = arith.constant 2 : index
    %2 = memref.load %arg1[%c2] : memref<3xf32, #tpu.memory_space<smem>>
    %c0_0 = arith.constant 0 : index
    %c0_1 = arith.constant 0 : index
    %3 = vector.load %arg3[%c0_0, %c0_1] : memref<16x128xbf16, #tpu.memory_space<vmem>>, vector<16x128xbf16>
    %c0_2 = arith.constant 0 : index
    %c0_3 = arith.constant 0 : index
    %4 = vector.load %arg5[%c0_2, %c0_3] : memref<128x128xbf16, #tpu.memory_space<vmem>>, vector<128x128xbf16>
    %cst = arith.constant dense<0.000000e+00> : vector<16x128xf32>
    %5 = tpu.matmul %3, %4, %cst {dimension_numbers = #tpu.dot_dimension_numbers<[1], [0], [0], [1], [0, 0, 1, 1], [], []>} : vector<16x128xbf16>, vector<128x128xbf16>, vector<16x128xf32> -> vector<16x128xf32>
    %6 = arith.truncf %5 : vector<16x128xf32> to vector<16x128xbf16>
    %c0_4 = arith.constant 0 : index
    %c0_5 = arith.constant 0 : index
    %7 = vector.load %arg12[%c0_4, %c0_5] : memref<16x128xbf16, #tpu.memory_space<vmem>>, vector<16x128xbf16>
    tpu.vector_store %arg12[%c0_4, %c0_5], %6 {strides = array<i32>} : memref<16x128xbf16, #tpu.memory_space<vmem>>, vector<16x128xbf16>,
    %c0_6 = arith.constant 0 : index
    %c0_7 = arith.constant 0 : index
    %8 = vector.load %arg4[%c0_6, %c0_7] : memref<16x16xf32, #tpu.memory_space<vmem>>, vector<16x16xf32>
    %c0_i32 = arith.constant 0 : i32
    %c16_i32 = arith.constant 16 : i32
    %9 = arith.muli %c0_i32, %c16_i32 : i32
    %10 = tpu.assume_multiple %9, 16 : i32
    %11 = arith.index_cast %10 : i32 to index
    %c0_8 = arith.constant 0 : index
    %12 = vector.load %arg2[%11, %c0_8] : memref<16x128xbf16, #tpu.memory_space<vmem>>, vector<16x128xbf16>
    %13 = arith.index_cast %10 : i32 to index
    %c0_9 = arith.constant 0 : index
    %14 = vector.load %arg12[%13, %c0_9] : memref<16x128xbf16, #tpu.memory_space<vmem>>, vector<16x128xbf16>
    %15 = arith.index_cast %10 : i32 to index
    %c0_10 = arith.constant 0 : index
    %16 = vector.load %arg3[%15, %c0_10] : memref<16x128xbf16, #tpu.memory_space<vmem>>, vector<16x128xbf16>
    %cst_11 = arith.constant dense<0.000000e+00> : vector<16x16xf32>
    %17 = tpu.matmul %12, %14, %cst_11 {dimension_numbers = #tpu.dot_dimension_numbers<[1], [1], [0], [0], [0, 0, 1, 0], [], []>} : vector<16x128xbf16>, vector<16x128xbf16>, vector<16x16xf32> -> vector<16x16xf32>
    %18 = vector.broadcast %2 : f32 to vector<16x16xf32>
    %19 = arith.mulf %17, %18 : vector<16x16xf32>
    %cst_12 = arith.constant dense<0xFF800000> : vector<16xf32>
    %20 = vector.multi_reduction <maximumf>, %19, %cst_12 [1] : vector<16x16xf32> to vector<16xf32>
    %21 = vector.shape_cast %20 : vector<16xf32> to vector<16x1xf32>
    %22 = vector.broadcast %21 : vector<16x1xf32> to vector<16x16xf32>
    %23 = arith.subf %19, %22 : vector<16x16xf32>
    %24 = math.exp %23 : vector<16x16xf32>
    %cst_13 = arith.constant dense<0.000000e+00> : vector<16xf32>
    %25 = vector.multi_reduction <add>, %24, %cst_13 [1] : vector<16x16xf32> to vector<16xf32>
    %26 = vector.shape_cast %25 : vector<16xf32> to vector<16x1xf32>
    %27 = tpu.reciprocal %26 {approx = true} : vector<16x1xf32> -> vector<16x1xf32>
    %28 = vector.broadcast %27 : vector<16x1xf32> to vector<16x16xf32>
    %29 = arith.mulf %24, %28 : vector<16x16xf32>
    %cst_14 = arith.constant 1.000000e+00 : f32
    %30 = arith.subf %cst_14, %0 : f32
    %31 = vector.broadcast %30 : f32 to vector<16x16xf32>
    %32 = arith.mulf %31, %29 : vector<16x16xf32>
    %33 = vector.broadcast %0 : f32 to vector<16x16xf32>
    %34 = arith.mulf %33, %8 : vector<16x16xf32>
    %35 = arith.addf %32, %34 : vector<16x16xf32>
    %36 = arith.truncf %35 : vector<16x16xf32> to vector<16x16xbf16>
    %cst_15 = arith.constant dense<0.000000e+00> : vector<16x128xf32>
    %37 = tpu.matmul %36, %16, %cst_15 {dimension_numbers = #tpu.dot_dimension_numbers<[1], [0], [0], [1], [0, 0, 1, 1], [], []>} : vector<16x16xbf16>, vector<16x128xbf16>, vector<16x128xf32> -> vector<16x128xf32>
    %38 = arith.truncf %37 : vector<16x128xf32> to vector<16x128xbf16>
    %39 = arith.index_cast %10 : i32 to index
    %c0_16 = arith.constant 0 : index
    %40 = vector.load %arg13[%39, %c0_16] : memref<16x128xbf16, #tpu.memory_space<vmem>>, vector<16x128xbf16>
    tpu.vector_store %arg13[%39, %c0_16], %38 {strides = array<i32>} : memref<16x128xbf16, #tpu.memory_space<vmem>>, vector<16x128xbf16>,
    %cst_17 = arith.constant 0.000000e+00 : f32
    %41 = vector.broadcast %cst_17 : f32 to vector<16x16xf32>
    %42 = arith.subf %41, %35 : vector<16x16xf32>
    %cst_18 = arith.constant 9.99999993E-9 : f32
    %43 = vector.broadcast %cst_18 : f32 to vector<16x16xf32>
    %44 = arith.addf %35, %43 : vector<16x16xf32>
    %45 = math.log %44 : vector<16x16xf32>
    %46 = arith.mulf %42, %45 : vector<16x16xf32>
    %cst_19 = arith.constant dense<0.000000e+00> : vector<16xf32>
    %47 = vector.multi_reduction <add>, %46, %cst_19 [1] : vector<16x16xf32> to vector<16xf32>
    %48 = vector.shape_cast %47 : vector<16xf32> to vector<16x1xf32>
    %49 = vector.broadcast %1 : f32 to vector<16x1xf32>
    %50 = arith.mulf %49, %48 : vector<16x1xf32>
    %51 = arith.negf %50 : vector<16x1xf32>
    %52 = math.exp %51 : vector<16x1xf32>
    %cst_20 = arith.constant 1.000000e+00 : f32
    %53 = vector.broadcast %cst_20 : f32 to vector<16x1xf32>
    %54 = arith.addf %53, %52 : vector<16x1xf32>
    %55 = arith.divf %53, %54 : vector<16x1xf32>
    %cst_21 = arith.constant 1.000000e+00 : f32
    %56 = vector.broadcast %cst_21 : f32 to vector<16x1xf32>
    %57 = arith.subf %56, %55 : vector<16x1xf32>
    %cst_22 = arith.constant 2.000000e+00 : f32
    %58 = vector.broadcast %cst_22 : f32 to vector<16x1xf32>
    %59 = arith.mulf %58, %57 : vector<16x1xf32>
    %60 = arith.index_cast %10 : i32 to index
    %c0_23 = arith.constant 0 : index
    %61 = vector.load %arg14[%60, %c0_23] : memref<16x1xf32, #tpu.memory_space<vmem>>, vector<16x1xf32>
    tpu.vector_store %arg14[%60, %c0_23], %59 {strides = array<i32>} : memref<16x1xf32, #tpu.memory_space<vmem>>, vector<16x1xf32>,
    %c1_i32 = arith.constant 1 : i32
    %c0_i32_24 = arith.constant 0 : i32
    %c16_i32_25 = arith.constant 16 : i32
    %62 = arith.muli %c0_i32_24, %c16_i32_25 : i32
    %63 = tpu.assume_multiple %62, 16 : i32
    %64 = arith.index_cast %63 : i32 to index
    %c0_26 = arith.constant 0 : index
    %65 = vector.load %arg2[%64, %c0_26] : memref<16x128xbf16, #tpu.memory_space<vmem>>, vector<16x128xbf16>
    %66 = arith.index_cast %63 : i32 to index
    %c0_27 = arith.constant 0 : index
    %67 = vector.load %arg13[%66, %c0_27] : memref<16x128xbf16, #tpu.memory_space<vmem>>, vector<16x128xbf16>
    %c0_28 = arith.constant 0 : index
    %c0_29 = arith.constant 0 : index
    %68 = vector.load %arg6[%c0_28, %c0_29] : memref<128x128xbf16, #tpu.memory_space<vmem>>, vector<128x128xbf16>
    %cst_30 = arith.constant dense<0.000000e+00> : vector<16x128xf32>
    %69 = tpu.matmul %65, %68, %cst_30 {dimension_numbers = #tpu.dot_dimension_numbers<[1], [0], [0], [1], [0, 0, 1, 1], [], []>} : vector<16x128xbf16>, vector<128x128xbf16>, vector<16x128xf32> -> vector<16x128xf32>
    %c0_31 = arith.constant 0 : index
    %c0_32 = arith.constant 0 : index
    %70 = vector.load %arg7[%c0_31, %c0_32] : memref<128x128xbf16, #tpu.memory_space<vmem>>, vector<128x128xbf16>
    %cst_33 = arith.constant dense<0.000000e+00> : vector<16x128xf32>
    %71 = tpu.matmul %67, %70, %cst_33 {dimension_numbers = #tpu.dot_dimension_numbers<[1], [0], [0], [1], [0, 0, 1, 1], [], []>} : vector<16x128xbf16>, vector<128x128xbf16>, vector<16x128xf32> -> vector<16x128xf32>
    %72 = arith.addf %69, %71 : vector<16x128xf32>
    %c0_34 = arith.constant 0 : index
    %c0_35 = arith.constant 0 : index
    %73 = vector.load %arg8[%c0_34, %c0_35] : memref<1x128xf32, #tpu.memory_space<vmem>>, vector<1x128xf32>
    %74 = vector.broadcast %73 : vector<1x128xf32> to vector<16x128xf32>
    %75 = arith.addf %72, %74 : vector<16x128xf32>
    %cst_36 = arith.constant 5.000000e-01 : f32
    %76 = vector.broadcast %cst_36 : f32 to vector<16x128xf32>
    %77 = arith.mulf %76, %75 : vector<16x128xf32>
    %78 = arith.mulf %75, %75 : vector<16x128xf32>
    %79 = arith.mulf %78, %75 : vector<16x128xf32>
    %cst_37 = arith.constant 4.471500e-02 : f32
    %80 = vector.broadcast %cst_37 : f32 to vector<16x128xf32>
    %81 = arith.mulf %80, %79 : vector<16x128xf32>
    %82 = arith.addf %75, %81 : vector<16x128xf32>
    %cst_38 = arith.constant 0.797884583 : f32
    %83 = vector.broadcast %cst_38 : f32 to vector<16x128xf32>
    %84 = arith.mulf %83, %82 : vector<16x128xf32>
    %85 = math.tanh %84 : vector<16x128xf32>
    %cst_39 = arith.constant 1.000000e+00 : f32
    %86 = vector.broadcast %cst_39 : f32 to vector<16x128xf32>
    %87 = arith.addf %86, %85 : vector<16x128xf32>
    %88 = arith.mulf %77, %87 : vector<16x128xf32>
    %89 = arith.truncf %88 : vector<16x128xf32> to vector<16x128xbf16>
    %c0_40 = arith.constant 0 : index
    %c0_41 = arith.constant 0 : index
    %90 = vector.load %arg9[%c0_40, %c0_41] : memref<128x128xbf16, #tpu.memory_space<vmem>>, vector<128x128xbf16>
    %cst_42 = arith.constant dense<0.000000e+00> : vector<16x128xf32>
    %91 = tpu.matmul %89, %90, %cst_42 {dimension_numbers = #tpu.dot_dimension_numbers<[1], [0], [0], [1], [0, 0, 1, 1], [], []>} : vector<16x128xbf16>, vector<128x128xbf16>, vector<16x128xf32> -> vector<16x128xf32>
    %c0_43 = arith.constant 0 : index
    %c0_44 = arith.constant 0 : index
    %92 = vector.load %arg10[%c0_43, %c0_44] : memref<1x128xf32, #tpu.memory_space<vmem>>, vector<1x128xf32>
    %93 = vector.broadcast %92 : vector<1x128xf32> to vector<16x128xf32>
    %94 = arith.addf %91, %93 : vector<16x128xf32>
    %95 = arith.index_cast %63 : i32 to index
    %c0_45 = arith.constant 0 : index
    %96 = vector.load %arg14[%95, %c0_45] : memref<16x1xf32, #tpu.memory_space<vmem>>, vector<16x1xf32>
    %97 = vector.broadcast %96 : vector<16x1xf32> to vector<16x128xf32>
    %98 = arith.mulf %94, %97 : vector<16x128xf32>
    %99 = arith.truncf %98 : vector<16x128xf32> to vector<16x128xbf16>
    %100 = arith.index_cast %63 : i32 to index
    %c0_46 = arith.constant 0 : index
    %101 = vector.load %arg11[%100, %c0_46] : memref<16x128xbf16, #tpu.memory_space<vmem>>, vector<16x128xbf16>
    tpu.vector_store %arg11[%100, %c0_46], %99 {strides = array<i32>} : memref<16x128xbf16, #tpu.memory_space<vmem>>, vector<16x128xbf16>,
    %c1_i32_47 = arith.constant 1 : i32
    return
  }
  func.func @transform_0(%arg0: i32) -> i32 {
    %c0_i32 = arith.constant 0 : i32
    %c0_i32_0 = arith.constant 0 : i32
    return %c0_i32 : i32
  }
  func.func @transform_1(%arg0: i32) -> (i32, i32) {
    %c0_i32 = arith.constant 0 : i32
    %c0_i32_0 = arith.constant 0 : i32
    return %arg0, %c0_i32 : i32, i32
  }
  func.func @transform_2(%arg0: i32) -> (i32, i32) {
    %c0_i32 = arith.constant 0 : i32
    %c0_i32_0 = arith.constant 0 : i32
    return %arg0, %c0_i32 : i32, i32
  }
  func.func @transform_3(%arg0: i32) -> (i32, i32) {
    %c0_i32 = arith.constant 0 : i32
    %c0_i32_0 = arith.constant 0 : i32
    %c0_i32_1 = arith.constant 0 : i32
    return %c0_i32, %c0_i32_0 : i32, i32
  }
  func.func @transform_4(%arg0: i32) -> (i32, i32) {
    %c0_i32 = arith.constant 0 : i32
    %c0_i32_0 = arith.constant 0 : i32
    %c0_i32_1 = arith.constant 0 : i32
    return %c0_i32, %c0_i32_0 : i32, i32
  }
  func.func @transform_5(%arg0: i32) -> (i32, i32) {
    %c0_i32 = arith.constant 0 : i32
    %c0_i32_0 = arith.constant 0 : i32
    %c0_i32_1 = arith.constant 0 : i32
    return %c0_i32, %c0_i32_0 : i32, i32
  }
  func.func @transform_6(%arg0: i32) -> (i32, i32) {
    %c0_i32 = arith.constant 0 : i32
    %c0_i32_0 = arith.constant 0 : i32
    %c0_i32_1 = arith.constant 0 : i32
    return %c0_i32, %c0_i32_0 : i32, i32
  }
  func.func @transform_7(%arg0: i32) -> (i32, i32) {
    %c0_i32 = arith.constant 0 : i32
    %c0_i32_0 = arith.constant 0 : i32
    %c0_i32_1 = arith.constant 0 : i32
    return %c0_i32, %c0_i32_0 : i32, i32
  }
  func.func @transform_8(%arg0: i32) -> (i32, i32) {
    %c0_i32 = arith.constant 0 : i32
    %c0_i32_0 = arith.constant 0 : i32
    %c0_i32_1 = arith.constant 0 : i32
    return %c0_i32, %c0_i32_0 : i32, i32
  }
  func.func @transform_9(%arg0: i32) -> (i32, i32) {
    %c0_i32 = arith.constant 0 : i32
    %c0_i32_0 = arith.constant 0 : i32
    %c0_i32_1 = arith.constant 0 : i32
    return %c0_i32, %c0_i32_0 : i32, i32
  }
  func.func @transform_10(%arg0: i32) -> (i32, i32) {
    %c0_i32 = arith.constant 0 : i32
    %c0_i32_0 = arith.constant 0 : i32
    return %arg0, %c0_i32 : i32, i32
  }
}

module attributes {stable_mosaic.version = 11 : i64} {
  func.func @_dcr_kernel(%arg0: i32, %arg1: memref<3xf32, #tpu.memory_space<smem>>, %arg2: memref<16x128xbf16, #tpu.memory_space<vmem>>, %arg3: memref<16x128xbf16, #tpu.memory_space<vmem>>, %arg4: memref<16x16xf32, #tpu.memory_space<vmem>>, %arg5: memref<128x128xbf16, #tpu.memory_space<vmem>>, %arg6: memref<128x128xbf16, #tpu.memory_space<vmem>>, %arg7: memref<128x128xbf16, #tpu.memory_space<vmem>>, %arg8: memref<1x128xf32, #tpu.memory_space<vmem>>, %arg9: memref<128x128xbf16, #tpu.memory_space<vmem>>, %arg10: memref<1x128xf32, #tpu.memory_space<vmem>>, %arg11: memref<16x128xbf16, #tpu.memory_space<vmem>>, %arg12: memref<16x128xbf16, #tpu.memory_space<vmem>>, %arg13: memref<16x128xbf16, #tpu.memory_space<vmem>>, %arg14: memref<16x1xf32, #tpu.memory_space<vmem>>) attributes {dimension_semantics = [#tpu.dimension_semantics<parallel>], iteration_bounds = array<i64: 2>, scalar_prefetch = 0 : i64, scratch_operands = 3 : i64, tpu.core_type = #tpu.core_type<tc>, window_params = [{transform_indices = @transform_0, window_bounds = array<i64: 3>}, {transform_indices = @transform_1, window_bounds = array<i64: 16, 128>}, {transform_indices = @transform_2, window_bounds = array<i64: 16, 128>}, {pipeline_mode = #tpu.pipeline_mode<synchronous>, transform_indices = @transform_3, window_bounds = array<i64: 16, 16>}, {pipeline_mode = #tpu.pipeline_mode<synchronous>, transform_indices = @transform_4, window_bounds = array<i64: 128, 128>}, {pipeline_mode = #tpu.pipeline_mode<synchronous>, transform_indices = @transform_5, window_bounds = array<i64: 128, 128>}, {pipeline_mode = #tpu.pipeline_mode<synchronous>, transform_indices = @transform_6, window_bounds = array<i64: 128, 128>}, {pipeline_mode = #tpu.pipeline_mode<synchronous>, transform_indices = @transform_7, window_bounds = array<i64: 1, 128>}, {pipeline_mode = #tpu.pipeline_mode<synchronous>, transform_indices = @transform_8, window_bounds = array<i64: 128, 128>}, {pipeline_mode = #tpu.pipeline_mode<synchronous>, transform_indices = @transform_9, window_bounds = array<i64: 1, 128>}, {transform_indices = @transform_10, window_bounds = array<i64: 16, 128>}]} {
    %c0 = arith.constant 0 : index
    %0 = memref.load %arg1[%c0] : memref<3xf32, #tpu.memory_space<smem>>
    %c1 = arith.constant 1 : index
    %1 = memref.load %arg1[%c1] : memref<3xf32, #tpu.memory_space<smem>>
    %c2 = arith.constant 2 : index
    %2 = memref.load %arg1[%c2] : memref<3xf32, #tpu.memory_space<smem>>
    %c0_0 = arith.constant 0 : index
    %c0_1 = arith.constant 0 : index
    %3 = vector.load %arg3[%c0_0, %c0_1] : memref<16x128xbf16, #tpu.memory_space<vmem>>, vector<16x128xbf16>
    %c0_2 = arith.constant 0 : index
    %c0_3 = arith.constant 0 : index
    %4 = vector.load %arg5[%c0_2, %c0_3] : memref<128x128xbf16, #tpu.memory_space<vmem>>, vector<128x128xbf16>
    %cst = arith.constant dense<0.000000e+00> : vector<16x128xf32>
    %5 = tpu.matmul %3, %4, %cst {dimension_numbers = #tpu.dot_dimension_numbers<[1], [0], [0], [1], [0, 0, 1, 1], [], []>} : vector<16x128xbf16>, vector<128x128xbf16>, vector<16x128xf32> -> vector<16x128xf32>
    %6 = arith.truncf %5 : vector<16x128xf32> to vector<16x128xbf16>
    %c0_4 = arith.constant 0 : index
    %c0_5 = arith.constant 0 : index
    %7 = vector.load %arg12[%c0_4, %c0_5] : memref<16x128xbf16, #tpu.memory_space<vmem>>, vector<16x128xbf16>
    tpu.vector_store %arg12[%c0_4, %c0_5], %6 {strides = array<i32>} : memref<16x128xbf16, #tpu.memory_space<vmem>>, vector<16x128xbf16>,
    %c0_6 = arith.constant 0 : index
    %c0_7 = arith.constant 0 : index
    %8 = vector.load %arg4[%c0_6, %c0_7] : memref<16x16xf32, #tpu.memory_space<vmem>>, vector<16x16xf32>
    %c0_i32 = arith.constant 0 : i32
    %c16_i32 = arith.constant 16 : i32
    %9 = arith.muli %c0_i32, %c16_i32 : i32
    %10 = tpu.assume_multiple %9, 16 : i32
    %11 = arith.index_cast %10 : i32 to index
    %c0_8 = arith.constant 0 : index
    %12 = vector.load %arg2[%11, %c0_8] : memref<16x128xbf16, #tpu.memory_space<vmem>>, vector<16x128xbf16>
    %13 = arith.index_cast %10 : i32 to index
    %c0_9 = arith.constant 0 : index
    %14 = vector.load %arg12[%13, %c0_9] : memref<16x128xbf16, #tpu.memory_space<vmem>>, vector<16x128xbf16>
    %15 = arith.index_cast %10 : i32 to index
    %c0_10 = arith.constant 0 : index
    %16 = vector.load %arg3[%15, %c0_10] : memref<16x128xbf16, #tpu.memory_space<vmem>>, vector<16x128xbf16>
    %cst_11 = arith.constant dense<0.000000e+00> : vector<16x16xf32>
    %17 = tpu.matmul %12, %14, %cst_11 {dimension_numbers = #tpu.dot_dimension_numbers<[1], [1], [0], [0], [0, 0, 1, 0], [], []>} : vector<16x128xbf16>, vector<16x128xbf16>, vector<16x16xf32> -> vector<16x16xf32>
    %18 = vector.broadcast %2 : f32 to vector<16x16xf32>
    %19 = arith.mulf %17, %18 : vector<16x16xf32>
    %cst_12 = arith.constant dense<0xFF800000> : vector<16xf32>
    %20 = vector.multi_reduction <maximumf>, %19, %cst_12 [1] : vector<16x16xf32> to vector<16xf32>
    %21 = vector.shape_cast %20 : vector<16xf32> to vector<16x1xf32>
    %22 = vector.broadcast %21 : vector<16x1xf32> to vector<16x16xf32>
    %23 = arith.subf %19, %22 : vector<16x16xf32>
    %24 = math.exp %23 : vector<16x16xf32>
    %cst_13 = arith.constant dense<0.000000e+00> : vector<16xf32>
    %25 = vector.multi_reduction <add>, %24, %cst_13 [1] : vector<16x16xf32> to vector<16xf32>
    %26 = vector.shape_cast %25 : vector<16xf32> to vector<16x1xf32>
    %27 = tpu.reciprocal %26 {approx = true} : vector<16x1xf32> -> vector<16x1xf32>
    %28 = vector.broadcast %27 : vector<16x1xf32> to vector<16x16xf32>
    %29 = arith.mulf %24, %28 : vector<16x16xf32>
    %cst_14 = arith.constant 1.000000e+00 : f32
    %30 = arith.subf %cst_14, %0 : f32
    %31 = vector.broadcast %30 : f32 to vector<16x16xf32>
    %32 = arith.mulf %31, %29 : vector<16x16xf32>
    %33 = vector.broadcast %0 : f32 to vector<16x16xf32>
    %34 = arith.mulf %33, %8 : vector<16x16xf32>
    %35 = arith.addf %32, %34 : vector<16x16xf32>
    %36 = arith.truncf %35 : vector<16x16xf32> to vector<16x16xbf16>
    %cst_15 = arith.constant dense<0.000000e+00> : vector<16x128xf32>
    %37 = tpu.matmul %36, %16, %cst_15 {dimension_numbers = #tpu.dot_dimension_numbers<[1], [0], [0], [1], [0, 0, 1, 1], [], []>} : vector<16x16xbf16>, vector<16x128xbf16>, vector<16x128xf32> -> vector<16x128xf32>
    %38 = arith.truncf %37 : vector<16x128xf32> to vector<16x128xbf16>
    %39 = arith.index_cast %10 : i32 to index
    %c0_16 = arith.constant 0 : index
    %40 = vector.load %arg13[%39, %c0_16] : memref<16x128xbf16, #tpu.memory_space<vmem>>, vector<16x128xbf16>
    tpu.vector_store %arg13[%39, %c0_16], %38 {strides = array<i32>} : memref<16x128xbf16, #tpu.memory_space<vmem>>, vector<16x128xbf16>,
    %cst_17 = arith.constant 0.000000e+00 : f32
    %41 = vector.broadcast %cst_17 : f32 to vector<16x16xf32>
    %42 = arith.subf %41, %35 : vector<16x16xf32>
    %cst_18 = arith.constant 9.99999993E-9 : f32
    %43 = vector.broadcast %cst_18 : f32 to vector<16x16xf32>
    %44 = arith.addf %35, %43 : vector<16x16xf32>
    %45 = math.log %44 : vector<16x16xf32>
    %46 = arith.mulf %42, %45 : vector<16x16xf32>
    %cst_19 = arith.constant dense<0.000000e+00> : vector<16xf32>
    %47 = vector.multi_reduction <add>, %46, %cst_19 [1] : vector<16x16xf32> to vector<16xf32>
    %48 = vector.shape_cast %47 : vector<16xf32> to vector<16x1xf32>
    %49 = vector.broadcast %1 : f32 to vector<16x1xf32>
    %50 = arith.mulf %49, %48 : vector<16x1xf32>
    %51 = arith.negf %50 : vector<16x1xf32>
    %52 = math.exp %51 : vector<16x1xf32>
    %cst_20 = arith.constant 1.000000e+00 : f32
    %53 = vector.broadcast %cst_20 : f32 to vector<16x1xf32>
    %54 = arith.addf %53, %52 : vector<16x1xf32>
    %55 = arith.divf %53, %54 : vector<16x1xf32>
    %cst_21 = arith.constant 1.000000e+00 : f32
    %56 = vector.broadcast %cst_21 : f32 to vector<16x1xf32>
    %57 = arith.subf %56, %55 : vector<16x1xf32>
    %cst_22 = arith.constant 2.000000e+00 : f32
    %58 = vector.broadcast %cst_22 : f32 to vector<16x1xf32>
    %59 = arith.mulf %58, %57 : vector<16x1xf32>
    %60 = arith.index_cast %10 : i32 to index
    %c0_23 = arith.constant 0 : index
    %61 = vector.load %arg14[%60, %c0_23] : memref<16x1xf32, #tpu.memory_space<vmem>>, vector<16x1xf32>
    tpu.vector_store %arg14[%60, %c0_23], %59 {strides = array<i32>} : memref<16x1xf32, #tpu.memory_space<vmem>>, vector<16x1xf32>,
    %c1_i32 = arith.constant 1 : i32
    %c0_i32_24 = arith.constant 0 : i32
    %c16_i32_25 = arith.constant 16 : i32
    %62 = arith.muli %c0_i32_24, %c16_i32_25 : i32
    %63 = tpu.assume_multiple %62, 16 : i32
    %64 = arith.index_cast %63 : i32 to index
    %c0_26 = arith.constant 0 : index
    %65 = vector.load %arg2[%64, %c0_26] : memref<16x128xbf16, #tpu.memory_space<vmem>>, vector<16x128xbf16>
    %66 = arith.index_cast %63 : i32 to index
    %c0_27 = arith.constant 0 : index
    %67 = vector.load %arg13[%66, %c0_27] : memref<16x128xbf16, #tpu.memory_space<vmem>>, vector<16x128xbf16>
    %c0_28 = arith.constant 0 : index
    %c0_29 = arith.constant 0 : index
    %68 = vector.load %arg6[%c0_28, %c0_29] : memref<128x128xbf16, #tpu.memory_space<vmem>>, vector<128x128xbf16>
    %cst_30 = arith.constant dense<0.000000e+00> : vector<16x128xf32>
    %69 = tpu.matmul %65, %68, %cst_30 {dimension_numbers = #tpu.dot_dimension_numbers<[1], [0], [0], [1], [0, 0, 1, 1], [], []>} : vector<16x128xbf16>, vector<128x128xbf16>, vector<16x128xf32> -> vector<16x128xf32>
    %c0_31 = arith.constant 0 : index
    %c0_32 = arith.constant 0 : index
    %70 = vector.load %arg7[%c0_31, %c0_32] : memref<128x128xbf16, #tpu.memory_space<vmem>>, vector<128x128xbf16>
    %cst_33 = arith.constant dense<0.000000e+00> : vector<16x128xf32>
    %71 = tpu.matmul %67, %70, %cst_33 {dimension_numbers = #tpu.dot_dimension_numbers<[1], [0], [0], [1], [0, 0, 1, 1], [], []>} : vector<16x128xbf16>, vector<128x128xbf16>, vector<16x128xf32> -> vector<16x128xf32>
    %72 = arith.addf %69, %71 : vector<16x128xf32>
    %c0_34 = arith.constant 0 : index
    %c0_35 = arith.constant 0 : index
    %73 = vector.load %arg8[%c0_34, %c0_35] : memref<1x128xf32, #tpu.memory_space<vmem>>, vector<1x128xf32>
    %74 = vector.broadcast %73 : vector<1x128xf32> to vector<16x128xf32>
    %75 = arith.addf %72, %74 : vector<16x128xf32>
    %cst_36 = arith.constant 5.000000e-01 : f32
    %76 = vector.broadcast %cst_36 : f32 to vector<16x128xf32>
    %77 = arith.mulf %76, %75 : vector<16x128xf32>
    %78 = arith.mulf %75, %75 : vector<16x128xf32>
    %79 = arith.mulf %78, %75 : vector<16x128xf32>
    %cst_37 = arith.constant 4.471500e-02 : f32
    %80 = vector.broadcast %cst_37 : f32 to vector<16x128xf32>
    %81 = arith.mulf %80, %79 : vector<16x128xf32>
    %82 = arith.addf %75, %81 : vector<16x128xf32>
    %cst_38 = arith.constant 0.797884583 : f32
    %83 = vector.broadcast %cst_38 : f32 to vector<16x128xf32>
    %84 = arith.mulf %83, %82 : vector<16x128xf32>
    %85 = math.tanh %84 : vector<16x128xf32>
    %cst_39 = arith.constant 1.000000e+00 : f32
    %86 = vector.broadcast %cst_39 : f32 to vector<16x128xf32>
    %87 = arith.addf %86, %85 : vector<16x128xf32>
    %88 = arith.mulf %77, %87 : vector<16x128xf32>
    %89 = arith.truncf %88 : vector<16x128xf32> to vector<16x128xbf16>
    %c0_40 = arith.constant 0 : index
    %c0_41 = arith.constant 0 : index
    %90 = vector.load %arg9[%c0_40, %c0_41] : memref<128x128xbf16, #tpu.memory_space<vmem>>, vector<128x128xbf16>
    %cst_42 = arith.constant dense<0.000000e+00> : vector<16x128xf32>
    %91 = tpu.matmul %89, %90, %cst_42 {dimension_numbers = #tpu.dot_dimension_numbers<[1], [0], [0], [1], [0, 0, 1, 1], [], []>} : vector<16x128xbf16>, vector<128x128xbf16>, vector<16x128xf32> -> vector<16x128xf32>
    %c0_43 = arith.constant 0 : index
    %c0_44 = arith.constant 0 : index
    %92 = vector.load %arg10[%c0_43, %c0_44] : memref<1x128xf32, #tpu.memory_space<vmem>>, vector<1x128xf32>
    %93 = vector.broadcast %92 : vector<1x128xf32> to vector<16x128xf32>
    %94 = arith.addf %91, %93 : vector<16x128xf32>
    %95 = arith.index_cast %63 : i32 to index
    %c0_45 = arith.constant 0 : index
    %96 = vector.load %arg14[%95, %c0_45] : memref<16x1xf32, #tpu.memory_space<vmem>>, vector<16x1xf32>
    %97 = vector.broadcast %96 : vector<16x1xf32> to vector<16x128xf32>
    %98 = arith.mulf %94, %97 : vector<16x128xf32>
    %99 = arith.truncf %98 : vector<16x128xf32> to vector<16x128xbf16>
    %100 = arith.index_cast %63 : i32 to index
    %c0_46 = arith.constant 0 : index
    %101 = vector.load %arg11[%100, %c0_46] : memref<16x128xbf16, #tpu.memory_space<vmem>>, vector<16x128xbf16>
    tpu.vector_store %arg11[%100, %c0_46], %99 {strides = array<i32>} : memref<16x128xbf16, #tpu.memory_space<vmem>>, vector<16x128xbf16>,
    %c1_i32_47 = arith.constant 1 : i32
    return
  }
  func.func @transform_0(%arg0: i32) -> i32 {
    %c0_i32 = arith.constant 0 : i32
    %c0_i32_0 = arith.constant 0 : i32
    return %c0_i32 : i32
  }
  func.func @transform_1(%arg0: i32) -> (i32, i32) {
    %c0_i32 = arith.constant 0 : i32
    %c0_i32_0 = arith.constant 0 : i32
    return %arg0, %c0_i32 : i32, i32
  }
  func.func @transform_2(%arg0: i32) -> (i32, i32) {
    %c0_i32 = arith.constant 0 : i32
    %c0_i32_0 = arith.constant 0 : i32
    return %arg0, %c0_i32 : i32, i32
  }
  func.func @transform_3(%arg0: i32) -> (i32, i32) {
    %c0_i32 = arith.constant 0 : i32
    %c0_i32_0 = arith.constant 0 : i32
    %c0_i32_1 = arith.constant 0 : i32
    return %c0_i32, %c0_i32_0 : i32, i32
  }
  func.func @transform_4(%arg0: i32) -> (i32, i32) {
    %c0_i32 = arith.constant 0 : i32
    %c0_i32_0 = arith.constant 0 : i32
    %c0_i32_1 = arith.constant 0 : i32
    return %c0_i32, %c0_i32_0 : i32, i32
  }
  func.func @transform_5(%arg0: i32) -> (i32, i32) {
    %c0_i32 = arith.constant 0 : i32
    %c0_i32_0 = arith.constant 0 : i32
    %c0_i32_1 = arith.constant 0 : i32
    return %c0_i32, %c0_i32_0 : i32, i32
  }
  func.func @transform_6(%arg0: i32) -> (i32, i32) {
    %c0_i32 = arith.constant 0 : i32
    %c0_i32_0 = arith.constant 0 : i32
    %c0_i32_1 = arith.constant 0 : i32
    return %c0_i32, %c0_i32_0 : i32, i32
  }
  func.func @transform_7(%arg0: i32) -> (i32, i32) {
    %c0_i32 = arith.constant 0 : i32
    %c0_i32_0 = arith.constant 0 : i32
    %c0_i32_1 = arith.constant 0 : i32
    return %c0_i32, %c0_i32_0 : i32, i32
  }
  func.func @transform_8(%arg0: i32) -> (i32, i32) {
    %c0_i32 = arith.constant 0 : i32
    %c0_i32_0 = arith.constant 0 : i32
    %c0_i32_1 = arith.constant 0 : i32
    return %c0_i32, %c0_i32_0 : i32, i32
  }
  func.func @transform_9(%arg0: i32) -> (i32, i32) {
    %c0_i32 = arith.constant 0 : i32
    %c0_i32_0 = arith.constant 0 : i32
    %c0_i32_1 = arith.constant 0 : i32
    return %c0_i32, %c0_i32_0 : i32, i32
  }
  func.func @transform_10(%arg0: i32) -> (i32, i32) {
    %c0_i32 = arith.constant 0 : i32
    %c0_i32_0 = arith.constant 0 : i32
    return %arg0, %c0_i32 : i32, i32
  }
}

</mosaic_0001>

<bundles_post_ra>
// kernel: tpu_custom_call.1
= control target key start
LH: loop header
LB: loop body
LE: loop exit
PB: predicated region body
PF: predicated region fallthrough
CT: control target
= control target key end

     0   :  { %s2592_s0 = inlined_call_operand.hbm [shape: f32[3], index: 0, kind: input, shape index: {}]   ;;  %s2593_s1 = inlined_call_operand.hbm [shape: bf16[32,128], index: 1, kind: input, shape index: {}]   ;;  %s2594_s2 = inlined_call_operand.hbm [shape: bf16[32,128], index: 2, kind: input, shape index: {}]   ;;  %s2595_s3 = inlined_call_operand.hbm [shape: f32[16,16], index: 3, kind: input, shape index: {}]   ;;  %s2596_s4 = inlined_call_operand.hbm [shape: bf16[128,128], index: 4, kind: input, shape index: {}]   ;;  %s2597_s5 = inlined_call_operand.hbm [shape: bf16[128,128], index: 5, kind: input, shape index: {}]   ;;  %s2598_s6 = inlined_call_operand.hbm [shape: bf16[128,128], index: 6, kind: input, shape index: {}]   ;;  %s2599_s7 = inlined_call_operand.vmem [shape: f32[1,128], index: 7, kind: input, shape index: {}]   ;;  %s2600_s8 = inlined_call_operand.hbm [shape: bf16[128,128], index: 8, kind: input, shape index: {}]   ;;  %s2601_s9 = inlined_call_operand.vmem [shape: f32[1,128], index: 9, kind: input, shape index: {}]   ;;  %s2602_s10 = inlined_call_operand.hbm [shape: bf16[32,128], index: 10, kind: output, shape index: {}]  }
   0x1   :  { %2611 = sst [smem:[#allocation27_spill]] %s2592_s0 }
   0x2   :  { %2612 = sst [smem:[#allocation28_spill]] %s2593_s1 }
   0x3   :  { %2613 = sst [smem:[#allocation29_spill]] %s2595_s3 }
   0x4   :  { %2614 = sst [smem:[#allocation30_spill]] %s2596_s4 }
   0x5   :  { %2615 = sst [smem:[#allocation31_spill]] %s2597_s5 }
   0x6   :  { %2616 = sst [smem:[#allocation32_spill]] %s2601_s9 }
   0x7   :  { %2617 = sst [smem:[#allocation33_spill]] %s2602_s10 }
   0x8   :  { %15 = vsyncpa [#allocation8], 0 }
   0x9   :  { %16 = vsyncpa [#allocation6], 0 }
   0xa   :  { %18 = vsyncpa [#allocation6 + $0x1], 0 }
   0xb   :  { %19 = vsyncpa [#allocation11], 0 }
   0xc   :  { %21 = vsyncpa [#allocation11 + $0x1], 0 }
   0xd   :  { %22 = vsyncpa [#allocation14], 0 }
   0xe   :  { %23 = vsyncpa [#allocation17], 0 }
   0xf   :  { %24 = vsyncpa [#allocation7], 0 }
  0x10   :  { %26 = vsyncpa [#allocation7 + $0x1], 0  ;;  %s2130_s13 = smov 0   ;;  %s2132_s14 = smov 0  }
  0x11   :  { %s2134_s15 = smov 0   ;;  %s2136_s16 = smov 0  }
  0x12 LB: > { %s2057_s17 = smov [#allocation12]   ;;  %s2151_s19 = sadd.s32 4294967295, %s2055_s16   ;;  %s2055_s16 = sphi %s2136_s16, %s2651_s16   ;;  %s2051_s15 = sphi %s2134_s15, %s2650_s15   ;;  %s2047_s14 = sphi %s2132_s14, %s2649_s14   ;;  %s2043_s13 = sphi %s2130_s13, %s2648_s13  }
  0x13   : > { %s304_s18 = sshll.u32 %s2057_s17, 4  ;;  %p1357_p0 = scmp.ge.s32.totalorder %s2055_s16, 1  ;;  %s2156_s18 = int_to_ptr.vmem [resolvable:$true] %s304_s18 }
  0x14   : > { %p2604_p1 = scmp.eq.s32.totalorder %s2151_s19, 0  ;;  %p283_p2 = scmp.lt.s32.totalorder %s2055_s16, 3 }
  0x15   : > { %s2058_s21 = smov [#allocation13]   ;;  %s2059_s24 = smov [#allocation16]  }
  0x16   : > { %p2158_p3 = pnand %p1357_p0, %p283_p2  ;;  %s317_s22 = sshll.u32 %s2058_s21, 4  ;;  %s2171_s22 = int_to_ptr.vmem [resolvable:$true] %s317_s22 }
  0x17   : > { %s2173_s25 = sshll.u32 %s2059_s24, 4  ;;  %s2620_s3 = sld [smem:[#allocation29_spill]]  ;;  %s344_s25 = int_to_ptr.vmem [resolvable:$true] %s2173_s25 }
  0x18   : > { %s2618_s20 = scalar_select %p2158_p3, 1, 0 }
  0x19   : > { %p1603_p5 = pneg %p2158_p3 }
  0x1b   : > { %p2167_p6 = pnand %p1603_p5, %p2604_p1 }
  0x1d   : > { %s1756_s28 = scalar_lea.hbm %s2620_s3, 256  ;;  %p2183_p8 = pneg %p2167_p6 }
  0x1e   : > { %p1757_p7 = scmp.ne.s32.totalorder %s2620_s3, %s1756_s28  ;;  %p1763_p11 = scmp.lt.u32.totalorder %s1756_s28, %s2620_s3 }
  0x20   : > { %p1759_p9 = pnand %p2183_p8, %p1757_p7 }
  0x22   : > { %p1760_p10 = pneg %p1759_p9 }
  0x24   : > { %p1765_p12 = pnand %p1763_p11, %p1760_p10 }
  0x26   : > { %1768 = shalt.err (!%p1765_p12)
}
  0x27   : > { %s1769_s21 = scalar_lea.vmem %s2156_s18, 256  ;;  %p1777_p5 = scmp.lt.s32.totalorder %s2156_s18, %s2156_s18 }
  0x28   : > { %p1770_p13 = scmp.ne.s32.totalorder %s2156_s18, %s1769_s21  ;;  %p1778_p4 = scmp.lt.s32.totalorder %s1769_s21, %s1769_s21 }
  0x2a   : > { %p1772_p0 = pnand %p1770_p13, %p2183_p8  ;;  %p1779_p7 = por %p1778_p4, %p1777_p5 }
  0x2c   : > { %p1773_p2 = pneg %p1772_p0 }
  0x2e   : > { %p1780_p9 = pnand %p1779_p7, %p1773_p2 }
  0x30   : > { %1783 = shalt.err (!%p1780_p9)
}
  0x31   : > { %s2060_s24 = smov 128   ;;  %s2061_s26 = smov 8  }
  0x32   : > { %1609 = dma.hbm_to_vmem [thread:$0]  (!%p2167_p6), %s2620_s3, 256, %s2156_s18, [#allocation11], %s2060_s24, %s2060_s24, %s2061_s26  }
  0x33   : > { %s2622_s4 = sld [smem:[#allocation30_spill]] }
  0x39   : > { %s1784_s12 = scalar_lea.hbm %s2622_s4, 1024 }
  0x3a   : > { %p1785_p4 = scmp.ne.s32.totalorder %s2622_s4, %s1784_s12  ;;  %p1791_p12 = scmp.lt.u32.totalorder %s1784_s12, %s2622_s4 }
  0x3c   : > { %p1787_p10 = pnand %p1785_p4, %p2183_p8 }
  0x3e   : > { %p1788_p11 = pneg %p1787_p10 }
  0x40   : > { %p1793_p13 = pnand %p1791_p12, %p1788_p11 }
  0x42   : > { %1796 = shalt.err (!%p1793_p13)
}
  0x43   : > { %s1797_s18 = scalar_lea.vmem %s2171_s22, 1024  ;;  %p1805_p7 = scmp.lt.s32.totalorder %s2171_s22, %s2171_s22 }
  0x44   : > { %p1798_p0 = scmp.ne.s32.totalorder %s2171_s22, %s1797_s18  ;;  %p1806_p9 = scmp.lt.s32.totalorder %s1797_s18, %s1797_s18 }
  0x46   : > { %p1800_p2 = pnand %p1798_p0, %p2183_p8  ;;  %p1807_p4 = por %p1806_p9, %p1805_p7 }
  0x48   : > { %p1801_p5 = pneg %p1800_p2 }
  0x4a   : > { %p1808_p10 = pnand %p1807_p4, %p1801_p5 }
  0x4c   : > { %1811 = shalt.err (!%p1808_p10)
}
  0x4d   : > { %s2606_s10 = smov 64   ;;  %s2608_s9 = smov 4  }
  0x4e   : > { %1612 = dma.hbm_to_vmem [thread:$0]  (!%p2167_p6), %s2622_s4, 1024, %s2171_s22, [#allocation14], %s2606_s10, %s2606_s10, %s2608_s9  }
  0x4f   : > { %s1812_s29 = scalar_lea.hbm %s2598_s6, 1024 }
  0x50   : > { %p1813_p11 = scmp.ne.s32.totalorder %s2598_s6, %s1812_s29  ;;  %p1819_p0 = scmp.lt.u32.totalorder %s1812_s29, %s2598_s6 }
  0x52   : > { %p1815_p12 = pnand %p1813_p11, %p2183_p8 }
  0x54   : > { %p1816_p13 = pneg %p1815_p12 }
  0x56   : > { %p1821_p2 = pnand %p1819_p0, %p1816_p13 }
  0x58   : > { %1824 = shalt.err (!%p1821_p2)
}
  0x59   : > { %s1825_s18 = scalar_lea.vmem %s344_s25, 1024  ;;  %p1833_p4 = scmp.lt.s32.totalorder %s344_s25, %s344_s25 }
  0x5a   : > { %p1826_p5 = scmp.ne.s32.totalorder %s344_s25, %s1825_s18  ;;  %p1834_p10 = scmp.lt.s32.totalorder %s1825_s18, %s1825_s18 }
  0x5c   : > { %p1828_p7 = pnand %p1826_p5, %p2183_p8  ;;  %p1835_p1 = por %p1834_p10, %p1833_p4 }
  0x5e   : > { %p1829_p9 = pneg %p1828_p7 }
  0x60   : > { %p1836_p3 = pnand %p1835_p1, %p1829_p9 }
  0x62   : > { %1839 = shalt.err (!%p1836_p3)
}
  0x63   : > { %1618 = dma.hbm_to_vmem [thread:$0]  (!%p2167_p6), %s2598_s6, 1024, %s344_s25, [#allocation17], %s2606_s10, %s2606_s10, %s2608_s9  }
  0x64   : > { %s2623_s0 = sld [smem:[#allocation27_spill]] }
  0x6a   : > { %s1840_s28 = scalar_lea.hbm %s2623_s0, 16 }
  0x6b   : > { %p1841_p11 = scmp.ne.s32.totalorder %s2623_s0, %s1840_s28  ;;  %p1847_p12 = scmp.lt.u32.totalorder %s1840_s28, %s2623_s0 }
  0x6d   : > { %p1843_p1 = pnand %p1841_p11, %p2183_p8 }
  0x6f   : > { %p1844_p3 = pneg %p1843_p1 }
  0x71   : > { %p1849_p13 = pnand %p1847_p12, %p1844_p3 }
  0x73   : > { %1852 = shalt.err (!%p1849_p13)
}
  0x74   : > { %s2064_s21 = smov [#allocation5]   ;;  %s2065_s22 = smov [#allocation15]  }
  0x75   : > { %1606 = dma.hbm_to_smem (!%p2167_p6), %s2623_s0, 16, %s2064_s21, [#allocation8]  }
  0x76   : > { %s330_s24 = sshll.u32 %s2065_s22, 4  ;;  %s2066_s26 = smov [#allocation18]   ;;  %s331_s24 = int_to_ptr.vmem [resolvable:$true] %s330_s24 }
  0x77   : > { %s359_s27 = sshll.u32 %s2066_s26, 4  ;;  %s2624_s5 = sld [smem:[#allocation31_spill]]  ;;  %s2268_s27 = int_to_ptr.vmem [resolvable:$true] %s359_s27 }
  0x7d   : > { %s1853_s28 = scalar_lea.hbm %s2624_s5, 1024 }
  0x7e   : > { %p1854_p0 = scmp.ne.s32.totalorder %s2624_s5, %s1853_s28  ;;  %p1860_p7 = scmp.lt.u32.totalorder %s1853_s28, %s2624_s5 }
  0x80   : > { %p1856_p2 = pnand %p1854_p0, %p2183_p8 }
  0x82   : > { %p1857_p5 = pneg %p1856_p2 }
  0x84   : > { %p1862_p9 = pnand %p1860_p7, %p1857_p5 }
  0x86   : > { %1865 = shalt.err (!%p1862_p9)
}
  0x87   : > { %s1866_s18 = scalar_lea.vmem %s331_s24, 1024  ;;  %p1874_p1 = scmp.lt.s32.totalorder %s331_s24, %s331_s24 }
  0x88   : > { %p1867_p4 = scmp.ne.s32.totalorder %s331_s24, %s1866_s18  ;;  %p1875_p3 = scmp.lt.s32.totalorder %s1866_s18, %s1866_s18 }
  0x8a   : > { %p1869_p10 = pnand %p1867_p4, %p2183_p8  ;;  %p1876_p12 = por %p1875_p3, %p1874_p1 }
  0x8c   : > { %p1870_p11 = pneg %p1869_p10 }
  0x8e   : > { %p1877_p13 = pnand %p1876_p12, %p1870_p11 }
  0x90   : > { %1880 = shalt.err (!%p1877_p13)
}
  0x91   : > { %1615 = dma.hbm_to_vmem [thread:$0]  (!%p2167_p6), %s2624_s5, 1024, %s331_s24, [#allocation14], %s2606_s10, %s2606_s10, %s2608_s9  }
  0x92   : > { %s1881_s28 = scalar_lea.hbm %s2600_s8, 1024 }
  0x93   : > { %p1882_p0 = scmp.ne.s32.totalorder %s2600_s8, %s1881_s28  ;;  %p1888_p7 = scmp.lt.u32.totalorder %s1881_s28, %s2600_s8 }
  0x95   : > { %p1884_p2 = pnand %p1882_p0, %p2183_p8 }
  0x97   : > { %p1885_p5 = pneg %p1884_p2 }
  0x99   : > { %p1890_p9 = pnand %p1888_p7, %p1885_p5 }
  0x9b   : > { %1893 = shalt.err (!%p1890_p9)
}
  0x9c   : > { %s1894_s24 = scalar_lea.vmem %s2268_s27, 1024  ;;  %p1902_p1 = scmp.lt.s32.totalorder %s2268_s27, %s2268_s27 }
  0x9d   : > { %p1895_p4 = scmp.ne.s32.totalorder %s2268_s27, %s1894_s24  ;;  %p1903_p3 = scmp.lt.s32.totalorder %s1894_s24, %s1894_s24 }
  0x9f   : > { %p1897_p10 = pnand %p1895_p4, %p2183_p8  ;;  %p1904_p12 = por %p1903_p3, %p1902_p1 }
  0xa1   : > { %p1898_p11 = pneg %p1897_p10 }
  0xa3   : > { %p1905_p13 = pnand %p1904_p12, %p1898_p11 }
  0xa5   : > { %1908 = shalt.err (!%p1905_p13)
}
  0xa6   : > { %1621 = dma.hbm_to_vmem [thread:$0]  (!%p2167_p6), %s2600_s8, 1024, %s2268_s27, [#allocation17], %s2606_s10, %s2606_s10, %s2608_s9  }
  0xa7   : > { %s1356_s23 = sadd.s32 4294967294, %s2055_s16   ;;  %s2319_s11 = sadd.s32 1, %s2055_s16  }
  0xa8   : > { %s57_s26 = ssub.s32 %s2055_s16, %s2319_s11  ;;  %s60_s29 = sadd.s32 1, %s2051_s15 }
  0xa9   : > { %p58_p8 = scmp.eq.s32.totalorder %s57_s26, 0  ;;  %p67_p0 = scmp.ne.s32.totalorder %s2051_s15, %s2047_s14 }
  0xaa   : > { %p68_p2 = scmp.eq.s32.totalorder %s2055_s16, 0  ;;  %p73_p5 = scmp.ne.s32.totalorder %s2047_s14, %s2043_s13 }
  0xab   : > { %s2330_s30 = scalar_select %p58_p8, %s2051_s15, %s60_s29  }
  0xac   : > { %p2332_p7 = por %p68_p2, %p67_p0  ;;  %p2626_p9 = scmp.eq.s32.totalorder %s2151_s19, 0 }
  0xad   : > { %p270_p4 = scmp.eq.s32.totalorder %s2151_s19, 1  ;;  %p276_p10 = scmp.eq.s32.totalorder %s1356_s23, 1 }
  0xae   : > { %p2338_p6 = por %p2626_p9, %p73_p5  ;;  %p1639_p11 = scmp.lt.s32.totalorder %s2055_s16, 2 }
  0xaf   : > { %s376_s12 = sand.u32 1, %s2051_s15   ;;  %p2345_p1 = por %p270_p4, %p67_p0 }
  0xb0   : > { %p2349_p3 = por %p276_p10, %p73_p5  ;;  %s1365_s21 = sshll.u32 %s376_s12, 3 }
  0xb1   : > { %s2628_s17 = scalar_select %p2345_p1, 1, 0 }
  0xb2   : > { %s2629_s25 = scalar_select %p2349_p3, 1, 0 }
  0xb3   : > { %s1431_s24 = sshll.u32 %s2055_s16, 7  ;;  %s2630_s1 = sld [smem:[#allocation28_spill]] }
  0xb4   : > { %s380_s23 = scalar_lea.vmem [#allocation9], %s1365_s21  ;;  %p2363_p12 = pnand %p1639_p11, %p2332_p7 }
  0xb5   : > { %s387_s29 = sshll.u32 %s380_s23, 4  ;;  %s2370_s18 = scalar_lea.hbm %s2594_s2, %s1431_s24  ;;  %s2359_s29 = int_to_ptr.vmem [resolvable:$true] %s387_s29 }
  0xb6   : > { %s401_s22 = scalar_lea.vmem [#allocation10], %s1365_s21  ;;  %s2374_s4 = scalar_lea.sflag [#allocation6], %s376_s12 }
  0xb7   : > { %s2372_s3 = sshll.u32 %s401_s22, 4  ;;  %p1911_p8 = pneg %p2363_p12  ;;  %s2406_s3 = int_to_ptr.vmem [resolvable:$true] %s2372_s3 }
  0xb9   : > { %s2357_s26 = scalar_lea.hbm %s2630_s1, %s1431_s24  ;;  %s1914_s0 = scalar_lea.hbm %s2630_s1, 256 }
  0xba   : > { %s1909_s23 = scalar_lea.hbm %s2357_s26, 128  ;;  %p1915_p5 = scmp.lt.u32.totalorder %s2357_s26, %s2630_s1 }
  0xbb   : > { %p1910_p13 = scmp.ne.s32.totalorder %s2357_s26, %s1909_s23  ;;  %p1916_p7 = scmp.lt.u32.totalorder %s1914_s0, %s1909_s23 }
  0xbc   : > { %p1918_p4 = scmp.lt.u32.totalorder %s1909_s23, %s2357_s26 }
  0xbd   : > { %p1912_p0 = pnand %p1911_p8, %p1910_p13  ;;  %p1917_p9 = por %p1916_p7, %p1915_p5 }
  0xbf   : > { %p1913_p2 = pneg %p1912_p0  ;;  %p1919_p10 = por %p1918_p4, %p1917_p9 }
  0xc1   : > { %p1920_p11 = pnand %p1919_p10, %p1913_p2 }
  0xc3   : > { %1923 = shalt.err (!%p1920_p11)
}
  0xc4   : > { %s1924_s12 = scalar_lea.vmem %s2359_s29, 128  ;;  %s2067_s5 = smov [#allocation9]  }
  0xc5   : > { %p1925_p13 = scmp.ne.s32.totalorder %s2359_s29, %s1924_s12  ;;  %s1929_s21 = sshll.u32 %s2067_s5, 4  ;;  %s1930_s21 = int_to_ptr.vmem [resolvable:$false] %s1929_s21 }
  0xc6   : > { %s1931_s22 = scalar_lea.vmem %s1930_s21, 256  ;;  %p1932_p1 = scmp.lt.s32.totalorder %s2359_s29, %s1930_s21 }
  0xc7   : > { %p1927_p0 = pnand %p1925_p13, %p1911_p8  ;;  %p1933_p5 = scmp.lt.s32.totalorder %s1931_s22, %s1924_s12 }
  0xc9   : > { %p1928_p3 = pneg %p1927_p0  ;;  %p1934_p7 = por %p1933_p5, %p1932_p1 }
  0xcb   : > { %p1935_p9 = pnand %p1934_p7, %p1928_p3 }
  0xcd   : > { %1938 = shalt.err (!%p1935_p9)
}
  0xce   : > { %s2632_s23 = smov 4   ;;  %s2633_s28 = smov 64  }
  0xcf   : > { %1625 = dma.hbm_to_vmem [thread:$0]  (!%p2363_p12), %s2357_s26, 128, %s2359_s29, %s2374_s4, %s2633_s28, %s2633_s28, %s2632_s23  }
  0xd0   : > { %s397_s0 = sand.u32 1, %s2055_s16   ;;  %s1939_s24 = scalar_lea.hbm %s2370_s18, 128 }
  0xd1   : > { %s2409_s9 = scalar_lea.sflag [#allocation11], %s397_s0  ;;  %p1940_p1 = scmp.ne.s32.totalorder %s2370_s18, %s1939_s24 }
  0xd2   : > { %s1944_s21 = scalar_lea.hbm %s2594_s2, 256  ;;  %p1945_p4 = scmp.lt.u32.totalorder %s2370_s18, %s2594_s2 }
  0xd3   : > { %p1942_p3 = pnand %p1940_p1, %p1911_p8  ;;  %p1946_p10 = scmp.lt.u32.totalorder %s1944_s21, %s1939_s24 }
  0xd4   : > { %p1948_p13 = scmp.lt.u32.totalorder %s1939_s24, %s2370_s18 }
  0xd5   : > { %p1943_p2 = pneg %p1942_p3  ;;  %p1947_p11 = por %p1946_p10, %p1945_p4 }
  0xd7   : > { %p1949_p0 = por %p1948_p13, %p1947_p11 }
  0xd9   : > { %p1950_p5 = pnand %p1949_p0, %p1943_p2 }
  0xdb   : > { %1953 = shalt.err (!%p1950_p5)
}
  0xdc   : > { %s1954_s4 = scalar_lea.vmem %s2406_s3, 128  ;;  %s2068_s26 = smov [#allocation10]  }
  0xdd   : > { %p1955_p7 = scmp.ne.s32.totalorder %s2406_s3, %s1954_s4  ;;  %s1959_s29 = sshll.u32 %s2068_s26, 4  ;;  %s1960_s29 = int_to_ptr.vmem [resolvable:$false] %s1959_s29 }
  0xde   : > { %s1961_s1 = scalar_lea.vmem %s1960_s29, 256  ;;  %p1962_p3 = scmp.lt.s32.totalorder %s2406_s3, %s1960_s29 }
  0xdf   : > { %p1957_p9 = pnand %p1955_p7, %p1911_p8  ;;  %p1963_p4 = scmp.lt.s32.totalorder %s1961_s1, %s1954_s4 }
  0xe1   : > { %p1958_p1 = pneg %p1957_p9  ;;  %p1964_p10 = por %p1963_p4, %p1962_p3 }
  0xe3   : > { %p1965_p11 = pnand %p1964_p10, %p1958_p1 }
  0xe5   : > { %1968 = shalt.err (!%p1965_p11)
}
  0xe6   : > { %1628 = dma.hbm_to_vmem [thread:$0]  (!%p2363_p12), %s2370_s18, 128, %s2406_s3, %s2409_s9, %s2633_s28, %s2633_s28, %s2632_s23  }
  0xe7   : > { %p2634_p8 = scmp.ne.s32.totalorder %s2618_s20, 0 }
  0xe8   : > { %p2635_p2 = scmp.eq.s32.totalorder (!%p2634_p8), %s2151_s19, 0 }
  0xe9   : > { %420 = sbr.rel (%p2634_p8) target bundleno = 1749 (0x6d5), region = 60 }
  0xf0   : > { %2014 = dma.done.wait (%p2635_p2), [#allocation8], 16   ;;  %p2636_p13 = pmov %p2635_p2 }
  0xf1   : > { %s2445_s0 = sand.u32 1, %s2047_s14  }
  0xf2   : > { %2016 = vsyncadd (%p2636_p13), [#allocation8], 4294967280  ;;  %s2448_s10 = sshll.u32 %s2445_s0, 3  ;;  %s427_s24 = scalar_lea.sflag [#allocation6], %s2445_s0 }
  0xf3   : > { %s430_s3 = scalar_lea.vmem [#allocation9], %s2448_s10 }
  0xf4   : > { %2018 = dma.done.wait (%p2338_p6), %s427_s24, 128  }
  0xf5   : > { %2020 = vsyncadd (%p2338_p6), %s427_s24, 4294967168  ;;  %s435_s20 = sand.u32 1, %s2151_s19   ;;  %s439_s23 = scalar_lea.vmem [#allocation10], %s2448_s10 }
  0xf6   : > { %s436_s18 = scalar_lea.sflag [#allocation11], %s435_s20 }
  0xf7   : > { %2022 = dma.done.wait (%p2338_p6), %s436_s18, 128  }
  0xf8   : > { %2024 = vsyncadd (%p2338_p6), %s436_s18, 4294967168  ;;  %p2637_p12 = pmov %p2635_p2 }
  0xf9   : > { %p2638_p0 = pmov %p2635_p2 }
  0xfa   : > { %2026 = dma.done.wait (%p2637_p12), [#allocation11], 256  }
  0xfb   : > { %2028 = vsyncadd (%p2638_p0), [#allocation11], 4294967040  ;;  %p2639_p5 = pmov %p2638_p0 }
  0xfc   : > { %p2640_p7 = pmov %p2638_p0 }
  0xfd   : > { %2030 = dma.done.wait (%p2639_p5), [#allocation14], 2048  }
  0xfe   : > { %2032 = vsyncadd (%p2640_p7), [#allocation14], 4294965248  ;;  %p2641_p9 = pmov %p2638_p0 }
  0xff   : > { %p2642_p1 = pmov %p2638_p0 }
 0x100   : > { %2034 = dma.done.wait (%p2641_p9), [#allocation17], 2048  }
 0x101   : > { %2036 = vsyncadd (%p2642_p1), [#allocation17], 4294965248 }
 0x102   : > { %464 = sfence }
 0x103   : > { %v1696_v0 = vld [vmem:[#allocation13] sm:$0xff]   ;;  %v2069_v1 = vmov 0.0   ;;  %v1697_v2 = vld [vmem:[#allocation13 + $0x8] sm:$0xff]   ;;  %vm2070_vm0 = vmmov 0   ;;  %v1698_v3 = vld [vmem:[#allocation13 + $0x10] sm:$0xff]   ;;  %s1382_s27 = sld [smem:[#allocation5 + $0x2]] }
 0x104   : > { %1481 = vmatprep.subr.bf16.mxu0 %v2069_v1  ;;  %1507 = vmatprep.subr.bf16.mxu1 %v2069_v1  ;;  %v1699_v4 = vld [vmem:[#allocation13 + $0x18] sm:$0xff]   ;;  %v1700_v5 = vld [vmem:[#allocation13 + $0x20] sm:$0xff]   ;;  %v1701_v6 = vld [vmem:[#allocation13 + $0x28] sm:$0xff]   ;;  %vm681_vm1 = vcmask 130048   ;;  %s506_s28 = sld [smem:[#allocation5]]  ;;  %s1381_s12 = sld [smem:[#allocation5 + $0x1]] }
 0x105   : > { %1482 = vmatpush3.bf16.msra.mxu0 %v1696_v0  ;;  %1497 = vmatprep.mubr.msk.bf16.mxu0 %vm2070_vm0, %v2069_v1  ;;  %v1702_v7 = vld [vmem:[#allocation13 + $0x30] sm:$0xff]   ;;  %v1703_v8 = vld [vmem:[#allocation13 + $0x38] sm:$0xff]   ;;  %v1704_v9 = vld [vmem:[%s439_s23] sm:$0xff]   ;;  %vm801_vm2 = vcmask 7168   ;;  %s2643_s26 = sld [smem:[#allocation32_spill]]  ;;  %s501_s29 = scalar_lea.vmem [#allocation19], %s2448_s10 }
 0x106   : > { %1483 = vmatprep.subr.bf16.mxu0 %v2069_v1  ;;  %1509 = vmatprep.mubr.msk.bf16.mxu1 %vm2070_vm0, %v2069_v1  ;;  %v1705_v15 = vld [vmem:[%s430_s3] sm:$0xff]   ;;  %v1706_v35 = vld [vmem:[%s439_s23] sm:$0xff]   ;;  %s1201_s1 = sshll.u32 %s501_s29, 4  ;;  %s1435_s24 = sshll.u32 %s2151_s19, 7  ;;  %s2548_s1 = int_to_ptr.vmem [resolvable:$true] %s1201_s1 }
 0x107   : > { %1508 = vmatpush3.bf16.msra.mxu1 %v1706_v35  ;;  %v624_v38 = vld [vmem:[#allocation12] sm:$0xff]  ;;  %v625_v44 = vld [vmem:[#allocation12 + $0x8] sm:$0xff]  ;;  %s2644_s18 = sld [smem:[#allocation33_spill]]  ;;  %s1188_s10 = scalar_lea.sflag [#allocation7], %s2445_s0 }
 0x108   : > { %1513 = vmatprep.subr.bf16.mxu1 %v2069_v1  ;;  %p2645_p3 = scmp.ne.s32.totalorder %s2628_s17, 0  ;;  %s2072_s19 = smov [#allocation19]  }
 0x109   : > { %1484 = vmatpush3.bf16.msra.mxu0 %v1697_v2  ;;  %v678_v16 = vstv %s1382_s27  ;;  %v1707_v2 = vld [vmem:[#allocation15] sm:$0xff]   ;;  %s1969_s27 = scalar_lea.vmem %s2548_s1, 128 }
 0x10a   : > { %1485 = vmatprep.subr.bf16.mxu0 %v2069_v1  ;;  %s704_s9 = ssub.f32 1.0, %s506_s28  ;;  %v708_v39 = vstv %s506_s28  ;;  %p1970_p6 = scmp.ne.s32.totalorder %s2548_s1, %s1969_s27 }
 0x10b   : > { %v709_v43 = vmul.f32 %v708_v39, %v624_v38  ;;  %v710_v48 = vmul.f32 %v708_v39, %v625_v44  ;;  %s1973_s28 = sshll.u32 %s2072_s19, 4  ;;  %s1974_s28 = int_to_ptr.vmem [resolvable:$false] %s1973_s28 }
 0x10c   : > { %v705_v41 = vstv %s704_s9  ;;  %p1971_p4 = pnand %p1970_p6, %p2645_p3  ;;  %s1975_s9 = scalar_lea.vmem %s1974_s28, 256 }
 0x10d   : > { %1486 = vmatpush3.bf16.msra.mxu0 %v1698_v3  ;;  %v1708_v3 = vld [vmem:[#allocation16] sm:$0xff]   ;;  %s2546_s23 = scalar_lea.hbm %s2644_s18, %s1435_s24  ;;  %p1976_p11 = scmp.lt.s32.totalorder %s2548_s1, %s1974_s28 }
 0x10e   : > { %1487 = vmatprep.subr.bf16.mxu0 %v2069_v1  ;;  %p1972_p10 = pneg %p1971_p4  ;;  %p1977_p8 = scmp.lt.s32.totalorder %s1975_s9, %s1969_s27 }
 0x110   : > { %p1978_p2 = por %p1977_p8, %p1976_p11 }
 0x111   : > { %1488 = vmatpush3.bf16.msra.mxu0 %v1699_v4  ;;  %v1709_v4 = vld [vmem:[#allocation15 + $0x8] sm:$0xff]  }
 0x112   : > { %1489 = vmatprep.subr.bf16.mxu0 %v2069_v1  ;;  %p1979_p13 = pnand %p1978_p2, %p1972_p10 }
 0x115   : > { %1490 = vmatpush3.bf16.msra.mxu0 %v1700_v5  ;;  %v1710_v5 = vld [vmem:[#allocation16 + $0x8] sm:$0xff]  }
 0x116   : > { %1491 = vmatprep.subr.bf16.mxu0 %v2069_v1 }
 0x119   : > { %1492 = vmatpush3.bf16.msra.mxu0 %v1701_v6  ;;  %v1711_v6 = vld [vmem:[#allocation15 + $0x10] sm:$0xff]  }
 0x11a   : > { %1493 = vmatprep.subr.bf16.mxu0 %v2069_v1 }
 0x11d   : > { %1494 = vmatpush3.bf16.msra.mxu0 %v1702_v7  ;;  %v1712_v7 = vld [vmem:[#allocation16 + $0x10] sm:$0xff]  }
 0x11e   : > { %1495 = vmatprep.subr.bf16.mxu0 %v2069_v1 }
 0x121   : > { %1496 = vmatpush3.bf16.msra.mxu0 %v1703_v8  ;;  %v2071_v8 = vmov 0  }
 0x122   : > { %1501 = vmatprep.subr.bf16.mxu0 %v2069_v1  ;;  %1694 = vset.pattern.permute.xlu0 %v2071_v8 }
 0x123   : > { %1695 = vset.pattern.permute.xlu1 %v2071_v8 }
 0x124   : > { %1498 = vmatmul.mubr.bf16.vlgmr.msra.gmra.mrb[0].mxu0 %v1704_v9  ;;  %v1713_v9 = vld [vmem:[#allocation15 + $0x18] sm:$0xff]  }
 0x125   : > { %1503 = vmatprep.mubr.msk.bf16.mxu0 %vm2070_vm0, %v2069_v1 }
 0x1f7   : > { %v615_v10 = vpop.f32.mrb[0].mxu0 }
 0x1f8   : > { %v1499_v11 = vpop.f32.mrb[1].mxu0 }
 0x1f9   : > { %v618_v12 = vpop.f32.mrb[2].mxu0  ;;  %v1715_v11 = vld [vmem:[#allocation15 + $0x20] sm:$0xff]  }
 0x1fa   : > { %v622_v13 = vpack.c.bf16 %v618_v12, %v615_v10  ;;  %v1500_v14 = vpop.f32.mrb[3].mxu0  ;;  %v1714_v10 = vld [vmem:[#allocation16 + $0x18] sm:$0xff]   ;;  %v1716_v12 = vld [vmem:[#allocation16 + $0x20] sm:$0xff]  }
 0x1fb   : > { %v1718_v14 = vld [vmem:[#allocation16 + $0x28] sm:$0xff]  }
 0x1fc   : > { %1502 = vmatpush3.bf16.xpose.msra.mxu0 %v622_v13  ;;  %v1717_v13 = vld [vmem:[#allocation15 + $0x28] sm:$0xff]  }
 0x1fd   : > { %1533 = vmatprep.subr.bf16.mxu0 %v2069_v1 }
 0x203   : > { %1504 = vmatmul.mubr.bf16.vlgmr.msra.gmra.mrb[4].mxu0 %v1705_v15  ;;  %v1719_v15 = vld [vmem:[#allocation15 + $0x30] sm:$0xff]  }
 0x204   : > { %1549 = vmatprep.mubr.msk.bf16.mxu0 %vm2070_vm0, %v2069_v1  ;;  %1534 = vmatpush3.bf16.msra.mxu0 %v1707_v2 }
 0x205   : > { %1535 = vmatprep.subr.bf16.mxu0 %v2069_v1 }
 0x208   : > { %1536 = vmatpush3.bf16.msra.mxu0 %v1709_v4 }
 0x209   : > { %1537 = vmatprep.subr.bf16.mxu0 %v2069_v1 }
 0x20c   : > { %1538 = vmatpush3.bf16.msra.mxu0 %v1711_v6 }
 0x20d   : > { %1539 = vmatprep.subr.bf16.mxu0 %v2069_v1 }
 0x210   : > { %1540 = vmatpush3.bf16.msra.mxu0 %v1713_v9 }
 0x211   : > { %1541 = vmatprep.subr.bf16.mxu0 %v2069_v1 }
 0x214   : > { %1542 = vmatpush3.bf16.msra.mxu0 %v1715_v11 }
 0x215   : > { %1543 = vmatprep.subr.bf16.mxu0 %v2069_v1 }
 0x218   : > { %1544 = vmatpush3.bf16.msra.mxu0 %v1717_v13 }
 0x219   : > { %1545 = vmatprep.subr.bf16.mxu0 %v2069_v1 }
 0x21c   : > { %1546 = vmatpush3.bf16.msra.mxu0 %v1719_v15 }
 0x21d   : > { %1547 = vmatprep.subr.bf16.mxu0 %v2069_v1 }
 0x2d6   : > { %v671_v17 = vpop.f32.mrb[4].mxu0 }
 0x2d7   : > { %v679_v18 = vmul.f32 %v678_v16, %v671_v17  ;;  %v1505_v19 = vpop.f32.mrb[5].mxu0  ;;  %v1721_v17 = vld [vmem:[#allocation15 + $0x38] sm:$0xff]  }
 0x2d8   : > { %v674_v20 = vpop.f32.mrb[6].mxu0  ;;  %1548 = vmatpush3.bf16.msra.mxu0 %v1721_v17  ;;  %v1723_v19 = vld [vmem:[%s430_s3] sm:$0xff]  }
 0x2d9   : > { %v680_v21 = vmul.f32 %v678_v16, %v674_v20  ;;  %v1506_v22 = vpop.f32.mrb[7].mxu0  ;;  %v682_v23 = vsel %vm681_vm1, %v679_v18, -inf  ;;  %v1720_v16 = vld [vmem:[#allocation16 + $0x30] sm:$0xff]   ;;  %v782_v20 = vstv %s1381_s12 }
 0x2da   : > { %683 = vmax.xlane.f32.xlu0 %v682_v23 }
 0x2db   : > { %v685_v24 = vsel %vm681_vm1, %v680_v21, -inf  ;;  %1550 = vmatmul.mubr.bf16.vlgmr.msra.gmra.mrb[8].mxu0 %v1723_v19 }
 0x2de   : > { %686 = vmax.xlane.f32.xlu0 %v685_v24 }
 0x367   : > { %v684_v25 = vpop.xlane.xlu0 %683 }
 0x368   : > { %v688_v26 = vsub.f32 %v679_v18, %v684_v25  ;;  %v1722_v18 = vld [vmem:[#allocation16 + $0x38] sm:$0xff]  }
 0x36a   : > { %v690_v27 = vmul.f32 1.442695, %v688_v26 }
 0x36b   : > { %v687_v28 = vpop.xlane.xlu0 %686 }
 0x36c   : > { %1732 = vpow2.f32 %v690_v27  ;;  %v689_v29 = vsub.f32 %v680_v21, %v687_v28 }
 0x36e   : > { %v692_v30 = vmul.f32 1.442695, %v689_v29 }
 0x370   : > { %1734 = vpow2.f32 %v692_v30 }
 0x376   : > { %v1733_v31 = vpop.eup %1732 }
 0x377   : > { %v694_v32 = vsel %vm681_vm1, %v1733_v31, 0.0 }
 0x378   : > { %695 = vadd.xlane.f32.xlu1 %v694_v32 }
 0x37a   : > { %v1735_v33 = vpop.eup %1734 }
 0x37b   : > { %v697_v34 = vsel %vm681_vm1, %v1735_v33, 0.0 }
 0x37c   : > { %698 = vadd.xlane.f32.xlu1 %v697_v34 }
 0x3ae   : > { %v1016_v44 = vpop.f32.mrb[8].mxu0 }
 0x405   : > { %v696_v36 = vpop.xlane.xlu1 %695 }
 0x406   : > { %1736 = vrcp.f32 %v696_v36 }
 0x409   : > { %v699_v37 = vpop.xlane.xlu1 %698 }
 0x40a   : > { %1738 = vrcp.f32 %v699_v37 }
 0x410   : > { %v1737_v40 = vpop.eup %1736 }
 0x411   : > { %v702_v42 = vmul.f32 %v1737_v40, %v1733_v31 }
 0x413   : > { %v706_v45 = vmul.f32 %v705_v41, %v702_v42 }
 0x414   : > { %v1739_v46 = vpop.eup %1738 }
 0x415   : > { %v703_v47 = vmul.f32 %v1739_v46, %v1735_v33  ;;  %v711_v49 = vadd.f32 %v709_v43, %v706_v45  ;;  %v1551_v45 = vpop.f32.mrb[9].mxu0 }
 0x416   : > { %v1019_v46 = vpop.f32.mrb[10].mxu0 }
 0x417   : > { %v707_v50 = vmul.f32 %v705_v41, %v703_v47  ;;  %v768_v51 = vadd.f32 1e-08, %v711_v49  ;;  %v766_v56 = vsub.f32 0.0, %v711_v49  ;;  %v1552_v47 = vpop.f32.mrb[11].mxu0 }
 0x419   : > { %v712_v52 = vadd.f32 %v710_v48, %v707_v50  ;;  %1740 = vlog2.f32 %v768_v51  ;;  %v1724_v48 = vld [vmem:[#allocation18] sm:$0xff]   ;;  %v1726_v50 = vld [vmem:[#allocation18 + $0x10] sm:$0xff]   ;;  %v1727_v51 = vld [vmem:[#allocation18 + $0x18] sm:$0xff]  }
 0x41b   : > { %v713_v53 = vpack.c.bf16 %v712_v52, %v711_v49  ;;  %v769_v54 = vadd.f32 1e-08, %v712_v52  ;;  %v767_v61 = vsub.f32 0.0, %v712_v52  ;;  %v1725_v49 = vld [vmem:[#allocation18 + $0x8] sm:$0xff]   ;;  %v1728_v52 = vld [vmem:[#allocation18 + $0x20] sm:$0xff]  }
 0x41d   : > { %1510 = vmatmul.mubr.msk.bf16.vlgmr.msra.gmra.mrb[0].mxu1 %vm681_vm1, %v713_v53  ;;  %1742 = vlog2.f32 %v769_v54  ;;  %v1729_v53 = vld [vmem:[#allocation18 + $0x28] sm:$0xff]   ;;  %v1730_v54 = vld [vmem:[#allocation18 + $0x30] sm:$0xff]  }
 0x41e   : > { %1529 = vmatprep.mubr.msk.bf16.mxu1 %vm2070_vm0, %v2069_v1  ;;  %1514 = vmatpush3.bf16.msra.mxu1 %v1708_v3 }
 0x41f   : > { %1515 = vmatprep.subr.bf16.mxu1 %v2069_v1 }
 0x422   : > { %1516 = vmatpush3.bf16.msra.mxu1 %v1710_v5 }
 0x423   : > { %v1741_v55 = vpop.eup %1740  ;;  %1517 = vmatprep.subr.bf16.mxu1 %v2069_v1 }
 0x424   : > { %v771_v57 = vmul.f32 0.6931472, %v1741_v55  ;;  %v1731_v55 = vld [vmem:[#allocation18 + $0x38] sm:$0xff]  }
 0x426   : > { %v774_v58 = vmul.f32 %v771_v57, %v766_v56  ;;  %1518 = vmatpush3.bf16.msra.mxu1 %v1712_v7  ;;  %v1414_v57 = vld [vmem:[%s2599_s7] ss:$0 sm:$0xff] }
 0x427   : > { %v1743_v59 = vpop.eup %1742  ;;  %1519 = vmatprep.subr.bf16.mxu1 %v2069_v1 }
 0x428   : > { %v776_v60 = vsel %vm681_vm1, %v774_v58, 0.0  ;;  %v773_v62 = vmul.f32 0.6931472, %v1743_v59 }
 0x429   : > { %777 = vadd.xlane.f32.xlu0 %v776_v60 }
 0x42a   : > { %v775_v63 = vmul.f32 %v773_v62, %v767_v61  ;;  %1520 = vmatpush3.bf16.msra.mxu1 %v1714_v10 }
 0x42b   : > { %1521 = vmatprep.subr.bf16.mxu1 %v2069_v1 }
 0x42c   : > { %v779_v0 = vsel %vm681_vm1, %v775_v63, 0.0 }
 0x42d   : > { %780 = vadd.xlane.f32.xlu1 %v779_v0 }
 0x42e   : > { %1522 = vmatpush3.bf16.msra.mxu1 %v1716_v12 }
 0x42f   : > { %1523 = vmatprep.subr.bf16.mxu1 %v2069_v1 }
 0x432   : > { %1524 = vmatpush3.bf16.msra.mxu1 %v1718_v14 }
 0x433   : > { %1525 = vmatprep.subr.bf16.mxu1 %v2069_v1 }
 0x436   : > { %1526 = vmatpush3.bf16.msra.mxu1 %v1720_v16 }
 0x437   : > { %1527 = vmatprep.subr.bf16.mxu1 %v2069_v1 }
 0x43a   : > { %1528 = vmatpush3.bf16.msra.mxu1 %v1722_v18 }
 0x43b   : > { %1553 = vmatprep.subr.bf16.mxu1 %v2069_v1 }
 0x4b6   : > { %v778_v21 = vpop.xlane.xlu0 %777 }
 0x4b7   : > { %v783_v22 = vmul.f32 %v782_v20, %v778_v21 }
 0x4b9   : > { %v1395_v23 = vmul.f32 -1.442695, %v783_v22 }
 0x4ba   : > { %v781_v24 = vpop.xlane.xlu1 %780 }
 0x4bb   : > { %1744 = vpow2.f32 %v1395_v23  ;;  %v784_v25 = vmul.f32 %v782_v20, %v781_v24  ;;  %v1415_v20 = vld [vmem:[%s2643_s26] ss:$0 sm:$0xff] }
 0x4bd   : > { %v1396_v26 = vmul.f32 -1.442695, %v784_v25 }
 0x4bf   : > { %1746 = vpow2.f32 %v1396_v26 }
 0x4c5   : > { %v1745_v27 = vpop.eup %1744 }
 0x4c6   : > { %v791_v28 = vadd.f32 1.0, %v1745_v27 }
 0x4c8   : > { %1748 = vrcp.f32 %v791_v28 }
 0x4c9   : > { %v1747_v29 = vpop.eup %1746 }
 0x4ca   : > { %v792_v30 = vadd.f32 1.0, %v1747_v29 }
 0x4cc   : > { %1750 = vrcp.f32 %v792_v30 }
 0x4d2   : > { %v1749_v31 = vpop.eup %1748 }
 0x4d3   : > { %v797_v32 = vsub.f32 1.0, %v1749_v31 }
 0x4d5   : > { %v799_v33 = vmul.f32 2.0, %v797_v32 }
 0x4d6   : > { %v1751_v34 = vpop.eup %1750 }
 0x4d7   : > { %802 = vst.msk [vmem:[#allocation4] sm:$0xff] %vm801_vm2, %v799_v33  ;;  %v798_v35 = vsub.f32 1.0, %v1751_v34 }
 0x4d9   : > { %v800_v36 = vmul.f32 2.0, %v798_v35 }
 0x4db   : > { %803 = vst.msk [vmem:[#allocation4 + $0x8] sm:$0xff] %vm801_vm2, %v800_v36 }
 0x4de   : > { %v1163_v37 = vld [vmem:[#allocation4] sm:$0xff] }
 0x4df   : > { %1167 = vperm.xlu0 %1694, %v1163_v37  }
 0x4e2   : > { %v1164_v38 = vld [vmem:[#allocation4 + $0x8] sm:$0xff] }
 0x4e3   : > { %1172 = vperm.xlu1 %1695, %v1164_v38  }
 0x4f0   : > { %v757_v39 = vpop.f32.mrb[0].mxu1 }
 0x4f1   : > { %v1511_v40 = vpop.f32.mrb[1].mxu1 }
 0x4f2   : > { %v760_v41 = vpop.f32.mrb[2].mxu1 }
 0x4f3   : > { %v764_v42 = vpack.c.bf16 %v760_v41, %v757_v39  ;;  %v1512_v43 = vpop.f32.mrb[3].mxu1 }
 0x4f5   : > { %1530 = vmatmul.mubr.bf16.vlgmr.msra.gmra.mrb[4].mxu1 %v764_v42 }
 0x4f6   : > { %1569 = vmatprep.mubr.msk.bf16.mxu1 %vm2070_vm0, %v2069_v1  ;;  %1554 = vmatpush3.bf16.msra.mxu1 %v1724_v48 }
 0x4f7   : > { %1555 = vmatprep.subr.bf16.mxu1 %v2069_v1 }
 0x4fa   : > { %1556 = vmatpush3.bf16.msra.mxu1 %v1725_v49 }
 0x4fb   : > { %1557 = vmatprep.subr.bf16.mxu1 %v2069_v1 }
 0x4fe   : > { %1558 = vmatpush3.bf16.msra.mxu1 %v1726_v50 }
 0x4ff   : > { %1559 = vmatprep.subr.bf16.mxu1 %v2069_v1 }
 0x502   : > { %1560 = vmatpush3.bf16.msra.mxu1 %v1727_v51 }
 0x503   : > { %1561 = vmatprep.subr.bf16.mxu1 %v2069_v1 }
 0x506   : > { %1562 = vmatpush3.bf16.msra.mxu1 %v1728_v52 }
 0x507   : > { %1563 = vmatprep.subr.bf16.mxu1 %v2069_v1 }
 0x50a   : > { %1564 = vmatpush3.bf16.msra.mxu1 %v1729_v53 }
 0x50b   : > { %1565 = vmatprep.subr.bf16.mxu1 %v2069_v1 }
 0x50e   : > { %1566 = vmatpush3.bf16.msra.mxu1 %v1730_v54 }
 0x50f   : > { %1567 = vmatprep.subr.bf16.mxu1 %v2069_v1 }
 0x512   : > { %1568 = vmatpush3.bf16.msra.mxu1 %v1731_v55 }
 0x55e   : > { %v1168_v27 = vpop.permute.xlu0 %1167 }
 0x562   : > { %v1173_v28 = vpop.permute.xlu1 %1172 }
 0x5c8   : > { %v921_v56 = vpop.f32.mrb[4].mxu1 }
 0x5c9   : > { %v1017_v58 = vadd.f32 %v1016_v44, %v921_v56  ;;  %v1531_v59 = vpop.f32.mrb[5].mxu1 }
 0x5ca   : > { %v924_v60 = vpop.f32.mrb[6].mxu1 }
 0x5cb   : > { %v1030_v61 = vadd.f32 %v1414_v57, %v1017_v58  ;;  %v1020_v62 = vadd.f32 %v1019_v46, %v924_v60  ;;  %v1532_v63 = vpop.f32.mrb[7].mxu1 }
 0x5cd   : > { %v1034_v0 = vmul.f32 %v1030_v61, %v1030_v61  ;;  %v1031_v2 = vadd.f32 %v1414_v57, %v1020_v62  ;;  %v1032_v14 = vmul.f32 0.5, %v1030_v61 }
 0x5cf   : > { %v1036_v3 = vmul.f32 %v1034_v0, %v1030_v61  ;;  %v1035_v4 = vmul.f32 %v1031_v2, %v1031_v2  ;;  %v1033_v15 = vmul.f32 0.5, %v1031_v2 }
 0x5d1   : > { %v1038_v5 = vmul.f32 0.044715, %v1036_v3  ;;  %v1037_v6 = vmul.f32 %v1035_v4, %v1031_v2 }
 0x5d3   : > { %v1040_v7 = vadd.f32 %v1038_v5, %v1030_v61  ;;  %v1039_v1 = vmul.f32 0.044715, %v1037_v6 }
 0x5d5   : > { %v1042_v8 = vmul.f32 0.7978846, %v1040_v7  ;;  %v1041_v9 = vadd.f32 %v1039_v1, %v1031_v2 }
 0x5d7   : > { %1752 = vtanh.f32 %v1042_v8  ;;  %v1043_v10 = vmul.f32 0.7978846, %v1041_v9 }
 0x5d9   : > { %1754 = vtanh.f32 %v1043_v10 }
 0x5e1   : > { %v1753_v11 = vpop.eup %1752 }
 0x5e2   : > { %v1046_v12 = vadd.f32 1.0, %v1753_v11 }
 0x5e3   : > { %v1755_v13 = vpop.eup %1754 }
 0x5e4   : > { %v1047_v16 = vadd.f32 1.0, %v1755_v13  ;;  %v1048_v17 = vmul.f32 %v1046_v12, %v1032_v14 }
 0x5e6   : > { %v1049_v18 = vmul.f32 %v1047_v16, %v1033_v15 }
 0x5e8   : > { %v1050_v19 = vpack.c.bf16 %v1049_v18, %v1048_v17 }
 0x5ea   : > { %1570 = vmatmul.mubr.bf16.vlgmr.msra.gmra.mrb[8].mxu1 %v1050_v19 }
 0x6bd   : > { %v1156_v21 = vpop.f32.mrb[8].mxu1 }
 0x6be   : > { %v1157_v22 = vadd.f32 %v1415_v20, %v1156_v21  ;;  %v1571_v23 = vpop.f32.mrb[9].mxu1 }
 0x6bf   : > { %v1159_v24 = vpop.f32.mrb[10].mxu1 }
 0x6c0   : > { %v1160_v25 = vadd.f32 %v1415_v20, %v1159_v24  ;;  %v1572_v26 = vpop.f32.mrb[11].mxu1  ;;  %v1175_v29 = vmul.f32 %v1168_v27, %v1157_v22 }
 0x6c2   : > { %v1176_v30 = vmul.f32 %v1173_v28, %v1160_v25 }
 0x6c4   : > { %v1439_v31 = vpack.c.bf16 %v1176_v30, %v1175_v29 }
 0x6c6   : > { %1440 = vst [vmem:[%s501_s29] sm:$0xff] %v1439_v31  }
 0x6c7   : > { %1982 = shalt.err (!%p1979_p13)
}
 0x6c8   : > { %s1983_s12 = scalar_lea.hbm %s2546_s23, 128  ;;  %s1987_s22 = scalar_lea.hbm %s2644_s18, 256 }
 0x6c9   : > { %p1984_p12 = scmp.ne.s32.totalorder %s2546_s23, %s1983_s12  ;;  %p1988_p7 = scmp.lt.u32.totalorder %s2546_s23, %s2644_s18 }
 0x6ca   : > { %p1989_p9 = scmp.lt.u32.totalorder %s1987_s22, %s1983_s12  ;;  %p1991_p6 = scmp.lt.u32.totalorder %s1983_s12, %s2546_s23 }
 0x6cb   : > { %p1985_p0 = pnand %p1984_p12, %p2645_p3 }
 0x6cc   : > { %p1990_p1 = por %p1989_p9, %p1988_p7 }
 0x6cd   : > { %p1986_p5 = pneg %p1985_p0 }
 0x6ce   : > { %p1992_p4 = por %p1991_p6, %p1990_p1 }
 0x6d0   : > { %p1993_p10 = pnand %p1992_p4, %p1986_p5 }
 0x6d2   : > { %1996 = shalt.err (!%p1993_p10)
}
 0x6d3   : > { %s2073_s29 = smov 64   ;;  %s2074_s24 = smov 4  }
 0x6d4   : > { %1601 = dma.vmem_to_hbm [thread:$0]  (%p2645_p3), %s2548_s1, 128, %s2546_s23, %s1188_s10, %s2073_s29, %s2073_s29, %s2074_s24  }
 0x6d5 PF: > { %s1216_s3 = sand.u32 1, %s2043_s13   ;;  %p2646_p11 = scmp.ne.s32.totalorder %s2629_s25, 0 }
 0x6d6   : > { %p2647_p8 = scmp.ge.s32.totalorder %s2055_s16, 2  ;;  %s1217_s20 = scalar_lea.sflag [#allocation7], %s1216_s3 }
 0x6d8   : > { %p1630_p2 = pnand %p2647_p8, %p2646_p11 }
 0x6da   : > { %2038 = dma.done.wait (!%p1630_p2), %s1217_s20, 128  }
 0x6db   : > { %2040 = vsyncadd (!%p1630_p2), %s1217_s20, 4294967168  ;;  %p29_p13 = scmp.ge.s32.totalorder %s2319_s11, 4   ;;  %s2648_s13 = smov %s2047_s14 }
 0x6dc   : > { %s2649_s14 = smov %s2051_s15  ;;  %s2650_s15 = smov %s2330_s30 }
 0x6dd   : > { %s2651_s16 = smov %s2319_s11  ;;  %31 = sbr.rel (!%p29_p13) target bundleno = 18 (0x12), region = 143 }
 0x6e4   :  { %1222 = vsyncpa [#allocation6], 1 }
 0x6e5   :  { %1224 = vsyncpa [#allocation6 + $0x1], 1 }
 0x6e6   :  { %1225 = vsyncpa [#allocation11], 1 }
 0x6e7   :  { %1227 = vsyncpa [#allocation11 + $0x1], 1 }
 0x6e8   :  { %1228 = vsyncpa [#allocation14], 1 }
 0x6e9   :  { %1229 = vsyncpa [#allocation17], 1 }
 0x6ea   :  { %1230 = vsyncpa [#allocation7], 1 }
 0x6eb   :  { %1232 = vsyncpa [#allocation7 + $0x1], 1 }
 0x6ec   :  { %1233 = vsyncpa [#allocation8], 1 }
 0x6ed   :  { %1235 = vsyncpa [#allocation8 + $0x1], 1 }

// kernel: tpu_custom_call.1
= control target key start
LH: loop header
LB: loop body
LE: loop exit
PB: predicated region body
PF: predicated region fallthrough
CT: control target
= control target key end

     0   :  { %s2592_s0 = inlined_call_operand.hbm [shape: f32[3], index: 0, kind: input, shape index: {}]   ;;  %s2593_s1 = inlined_call_operand.hbm [shape: bf16[32,128], index: 1, kind: input, shape index: {}]   ;;  %s2594_s2 = inlined_call_operand.hbm [shape: bf16[32,128], index: 2, kind: input, shape index: {}]   ;;  %s2595_s3 = inlined_call_operand.hbm [shape: f32[16,16], index: 3, kind: input, shape index: {}]   ;;  %s2596_s4 = inlined_call_operand.hbm [shape: bf16[128,128], index: 4, kind: input, shape index: {}]   ;;  %s2597_s5 = inlined_call_operand.hbm [shape: bf16[128,128], index: 5, kind: input, shape index: {}]   ;;  %s2598_s6 = inlined_call_operand.hbm [shape: bf16[128,128], index: 6, kind: input, shape index: {}]   ;;  %s2599_s7 = inlined_call_operand.vmem [shape: f32[1,128], index: 7, kind: input, shape index: {}]   ;;  %s2600_s8 = inlined_call_operand.hbm [shape: bf16[128,128], index: 8, kind: input, shape index: {}]   ;;  %s2601_s9 = inlined_call_operand.vmem [shape: f32[1,128], index: 9, kind: input, shape index: {}]   ;;  %s2602_s10 = inlined_call_operand.hbm [shape: bf16[32,128], index: 10, kind: output, shape index: {}]  }
   0x1   :  { %2611 = sst [smem:[#allocation27_spill]] %s2592_s0 }
   0x2   :  { %2612 = sst [smem:[#allocation28_spill]] %s2593_s1 }
   0x3   :  { %2613 = sst [smem:[#allocation29_spill]] %s2595_s3 }
   0x4   :  { %2614 = sst [smem:[#allocation30_spill]] %s2596_s4 }
   0x5   :  { %2615 = sst [smem:[#allocation31_spill]] %s2597_s5 }
   0x6   :  { %2616 = sst [smem:[#allocation32_spill]] %s2601_s9 }
   0x7   :  { %2617 = sst [smem:[#allocation33_spill]] %s2602_s10 }
   0x8   :  { %15 = vsyncpa [#allocation8], 0 }
   0x9   :  { %16 = vsyncpa [#allocation6], 0 }
   0xa   :  { %18 = vsyncpa [#allocation6 + $0x1], 0 }
   0xb   :  { %19 = vsyncpa [#allocation11], 0 }
   0xc   :  { %21 = vsyncpa [#allocation11 + $0x1], 0 }
   0xd   :  { %22 = vsyncpa [#allocation14], 0 }
   0xe   :  { %23 = vsyncpa [#allocation17], 0 }
   0xf   :  { %24 = vsyncpa [#allocation7], 0 }
  0x10   :  { %26 = vsyncpa [#allocation7 + $0x1], 0  ;;  %s2130_s13 = smov 0   ;;  %s2132_s14 = smov 0  }
  0x11   :  { %s2134_s15 = smov 0   ;;  %s2136_s16 = smov 0  }
  0x12 LB: > { %s2057_s17 = smov [#allocation12]   ;;  %s2151_s19 = sadd.s32 4294967295, %s2055_s16   ;;  %s2055_s16 = sphi %s2136_s16, %s2651_s16   ;;  %s2051_s15 = sphi %s2134_s15, %s2650_s15   ;;  %s2047_s14 = sphi %s2132_s14, %s2649_s14   ;;  %s2043_s13 = sphi %s2130_s13, %s2648_s13  }
  0x13   : > { %s304_s18 = sshll.u32 %s2057_s17, 4  ;;  %p1357_p0 = scmp.ge.s32.totalorder %s2055_s16, 1  ;;  %s2156_s18 = int_to_ptr.vmem [resolvable:$true] %s304_s18 }
  0x14   : > { %p2604_p1 = scmp.eq.s32.totalorder %s2151_s19, 0  ;;  %p283_p2 = scmp.lt.s32.totalorder %s2055_s16, 3 }
  0x15   : > { %s2058_s21 = smov [#allocation13]   ;;  %s2059_s24 = smov [#allocation16]  }
  0x16   : > { %p2158_p3 = pnand %p1357_p0, %p283_p2  ;;  %s317_s22 = sshll.u32 %s2058_s21, 4  ;;  %s2171_s22 = int_to_ptr.vmem [resolvable:$true] %s317_s22 }
  0x17   : > { %s2173_s25 = sshll.u32 %s2059_s24, 4  ;;  %s2620_s3 = sld [smem:[#allocation29_spill]]  ;;  %s344_s25 = int_to_ptr.vmem [resolvable:$true] %s2173_s25 }
  0x18   : > { %s2618_s20 = scalar_select %p2158_p3, 1, 0 }
  0x19   : > { %p1603_p5 = pneg %p2158_p3 }
  0x1b   : > { %p2167_p6 = pnand %p1603_p5, %p2604_p1 }
  0x1d   : > { %s1756_s28 = scalar_lea.hbm %s2620_s3, 256  ;;  %p2183_p8 = pneg %p2167_p6 }
  0x1e   : > { %p1757_p7 = scmp.ne.s32.totalorder %s2620_s3, %s1756_s28  ;;  %p1763_p11 = scmp.lt.u32.totalorder %s1756_s28, %s2620_s3 }
  0x20   : > { %p1759_p9 = pnand %p2183_p8, %p1757_p7 }
  0x22   : > { %p1760_p10 = pneg %p1759_p9 }
  0x24   : > { %p1765_p12 = pnand %p1763_p11, %p1760_p10 }
  0x26   : > { %1768 = shalt.err (!%p1765_p12)
}
  0x27   : > { %s1769_s21 = scalar_lea.vmem %s2156_s18, 256  ;;  %p1777_p5 = scmp.lt.s32.totalorder %s2156_s18, %s2156_s18 }
  0x28   : > { %p1770_p13 = scmp.ne.s32.totalorder %s2156_s18, %s1769_s21  ;;  %p1778_p4 = scmp.lt.s32.totalorder %s1769_s21, %s1769_s21 }
  0x2a   : > { %p1772_p0 = pnand %p1770_p13, %p2183_p8  ;;  %p1779_p7 = por %p1778_p4, %p1777_p5 }
  0x2c   : > { %p1773_p2 = pneg %p1772_p0 }
  0x2e   : > { %p1780_p9 = pnand %p1779_p7, %p1773_p2 }
  0x30   : > { %1783 = shalt.err (!%p1780_p9)
}
  0x31   : > { %s2060_s24 = smov 128   ;;  %s2061_s26 = smov 8  }
  0x32   : > { %1609 = dma.hbm_to_vmem [thread:$0]  (!%p2167_p6), %s2620_s3, 256, %s2156_s18, [#allocation11], %s2060_s24, %s2060_s24, %s2061_s26  }
  0x33   : > { %s2622_s4 = sld [smem:[#allocation30_spill]] }
  0x39   : > { %s1784_s12 = scalar_lea.hbm %s2622_s4, 1024 }
  0x3a   : > { %p1785_p4 = scmp.ne.s32.totalorder %s2622_s4, %s1784_s12  ;;  %p1791_p12 = scmp.lt.u32.totalorder %s1784_s12, %s2622_s4 }
  0x3c   : > { %p1787_p10 = pnand %p1785_p4, %p2183_p8 }
  0x3e   : > { %p1788_p11 = pneg %p1787_p10 }
  0x40   : > { %p1793_p13 = pnand %p1791_p12, %p1788_p11 }
  0x42   : > { %1796 = shalt.err (!%p1793_p13)
}
  0x43   : > { %s1797_s18 = scalar_lea.vmem %s2171_s22, 1024  ;;  %p1805_p7 = scmp.lt.s32.totalorder %s2171_s22, %s2171_s22 }
  0x44   : > { %p1798_p0 = scmp.ne.s32.totalorder %s2171_s22, %s1797_s18  ;;  %p1806_p9 = scmp.lt.s32.totalorder %s1797_s18, %s1797_s18 }
  0x46   : > { %p1800_p2 = pnand %p1798_p0, %p2183_p8  ;;  %p1807_p4 = por %p1806_p9, %p1805_p7 }
  0x48   : > { %p1801_p5 = pneg %p1800_p2 }
  0x4a   : > { %p1808_p10 = pnand %p1807_p4, %p1801_p5 }
  0x4c   : > { %1811 = shalt.err (!%p1808_p10)
}
  0x4d   : > { %s2606_s10 = smov 64   ;;  %s2608_s9 = smov 4  }
  0x4e   : > { %1612 = dma.hbm_to_vmem [thread:$0]  (!%p2167_p6), %s2622_s4, 1024, %s2171_s22, [#allocation14], %s2606_s10, %s2606_s10, %s2608_s9  }
  0x4f   : > { %s1812_s29 = scalar_lea.hbm %s2598_s6, 1024 }
  0x50   : > { %p1813_p11 = scmp.ne.s32.totalorder %s2598_s6, %s1812_s29  ;;  %p1819_p0 = scmp.lt.u32.totalorder %s1812_s29, %s2598_s6 }
  0x52   : > { %p1815_p12 = pnand %p1813_p11, %p2183_p8 }
  0x54   : > { %p1816_p13 = pneg %p1815_p12 }
  0x56   : > { %p1821_p2 = pnand %p1819_p0, %p1816_p13 }
  0x58   : > { %1824 = shalt.err (!%p1821_p2)
}
  0x59   : > { %s1825_s18 = scalar_lea.vmem %s344_s25, 1024  ;;  %p1833_p4 = scmp.lt.s32.totalorder %s344_s25, %s344_s25 }
  0x5a   : > { %p1826_p5 = scmp.ne.s32.totalorder %s344_s25, %s1825_s18  ;;  %p1834_p10 = scmp.lt.s32.totalorder %s1825_s18, %s1825_s18 }
  0x5c   : > { %p1828_p7 = pnand %p1826_p5, %p2183_p8  ;;  %p1835_p1 = por %p1834_p10, %p1833_p4 }
  0x5e   : > { %p1829_p9 = pneg %p1828_p7 }
  0x60   : > { %p1836_p3 = pnand %p1835_p1, %p1829_p9 }
  0x62   : > { %1839 = shalt.err (!%p1836_p3)
}
  0x63   : > { %1618 = dma.hbm_to_vmem [thread:$0]  (!%p2167_p6), %s2598_s6, 1024, %s344_s25, [#allocation17], %s2606_s10, %s2606_s10, %s2608_s9  }
  0x64   : > { %s2623_s0 = sld [smem:[#allocation27_spill]] }
  0x6a   : > { %s1840_s28 = scalar_lea.hbm %s2623_s0, 16 }
  0x6b   : > { %p1841_p11 = scmp.ne.s32.totalorder %s2623_s0, %s1840_s28  ;;  %p1847_p12 = scmp.lt.u32.totalorder %s1840_s28, %s2623_s0 }
  0x6d   : > { %p1843_p1 = pnand %p1841_p11, %p2183_p8 }
  0x6f   : > { %p1844_p3 = pneg %p1843_p1 }
  0x71   : > { %p1849_p13 = pnand %p1847_p12, %p1844_p3 }
  0x73   : > { %1852 = shalt.err (!%p1849_p13)
}
  0x74   : > { %s2064_s21 = smov [#allocation5]   ;;  %s2065_s22 = smov [#allocation15]  }
  0x75   : > { %1606 = dma.hbm_to_smem (!%p2167_p6), %s2623_s0, 16, %s2064_s21, [#allocation8]  }
  0x76   : > { %s330_s24 = sshll.u32 %s2065_s22, 4  ;;  %s2066_s26 = smov [#allocation18]   ;;  %s331_s24 = int_to_ptr.vmem [resolvable:$true] %s330_s24 }
  0x77   : > { %s359_s27 = sshll.u32 %s2066_s26, 4  ;;  %s2624_s5 = sld [smem:[#allocation31_spill]]  ;;  %s2268_s27 = int_to_ptr.vmem [resolvable:$true] %s359_s27 }
  0x7d   : > { %s1853_s28 = scalar_lea.hbm %s2624_s5, 1024 }
  0x7e   : > { %p1854_p0 = scmp.ne.s32.totalorder %s2624_s5, %s1853_s28  ;;  %p1860_p7 = scmp.lt.u32.totalorder %s1853_s28, %s2624_s5 }
  0x80   : > { %p1856_p2 = pnand %p1854_p0, %p2183_p8 }
  0x82   : > { %p1857_p5 = pneg %p1856_p2 }
  0x84   : > { %p1862_p9 = pnand %p1860_p7, %p1857_p5 }
  0x86   : > { %1865 = shalt.err (!%p1862_p9)
}
  0x87   : > { %s1866_s18 = scalar_lea.vmem %s331_s24, 1024  ;;  %p1874_p1 = scmp.lt.s32.totalorder %s331_s24, %s331_s24 }
  0x88   : > { %p1867_p4 = scmp.ne.s32.totalorder %s331_s24, %s1866_s18  ;;  %p1875_p3 = scmp.lt.s32.totalorder %s1866_s18, %s1866_s18 }
  0x8a   : > { %p1869_p10 = pnand %p1867_p4, %p2183_p8  ;;  %p1876_p12 = por %p1875_p3, %p1874_p1 }
  0x8c   : > { %p1870_p11 = pneg %p1869_p10 }
  0x8e   : > { %p1877_p13 = pnand %p1876_p12, %p1870_p11 }
  0x90   : > { %1880 = shalt.err (!%p1877_p13)
}
  0x91   : > { %1615 = dma.hbm_to_vmem [thread:$0]  (!%p2167_p6), %s2624_s5, 1024, %s331_s24, [#allocation14], %s2606_s10, %s2606_s10, %s2608_s9  }
  0x92   : > { %s1881_s28 = scalar_lea.hbm %s2600_s8, 1024 }
  0x93   : > { %p1882_p0 = scmp.ne.s32.totalorder %s2600_s8, %s1881_s28  ;;  %p1888_p7 = scmp.lt.u32.totalorder %s1881_s28, %s2600_s8 }
  0x95   : > { %p1884_p2 = pnand %p1882_p0, %p2183_p8 }
  0x97   : > { %p1885_p5 = pneg %p1884_p2 }
  0x99   : > { %p1890_p9 = pnand %p1888_p7, %p1885_p5 }
  0x9b   : > { %1893 = shalt.err (!%p1890_p9)
}
  0x9c   : > { %s1894_s24 = scalar_lea.vmem %s2268_s27, 1024  ;;  %p1902_p1 = scmp.lt.s32.totalorder %s2268_s27, %s2268_s27 }
  0x9d   : > { %p1895_p4 = scmp.ne.s32.totalorder %s2268_s27, %s1894_s24  ;;  %p1903_p3 = scmp.lt.s32.totalorder %s1894_s24, %s1894_s24 }
  0x9f   : > { %p1897_p10 = pnand %p1895_p4, %p2183_p8  ;;  %p1904_p12 = por %p1903_p3, %p1902_p1 }
  0xa1   : > { %p1898_p11 = pneg %p1897_p10 }
  0xa3   : > { %p1905_p13 = pnand %p1904_p12, %p1898_p11 }
  0xa5   : > { %1908 = shalt.err (!%p1905_p13)
}
  0xa6   : > { %1621 = dma.hbm_to_vmem [thread:$0]  (!%p2167_p6), %s2600_s8, 1024, %s2268_s27, [#allocation17], %s2606_s10, %s2606_s10, %s2608_s9  }
  0xa7   : > { %s1356_s23 = sadd.s32 4294967294, %s2055_s16   ;;  %s2319_s11 = sadd.s32 1, %s2055_s16  }
  0xa8   : > { %s57_s26 = ssub.s32 %s2055_s16, %s2319_s11  ;;  %s60_s29 = sadd.s32 1, %s2051_s15 }
  0xa9   : > { %p58_p8 = scmp.eq.s32.totalorder %s57_s26, 0  ;;  %p67_p0 = scmp.ne.s32.totalorder %s2051_s15, %s2047_s14 }
  0xaa   : > { %p68_p2 = scmp.eq.s32.totalorder %s2055_s16, 0  ;;  %p73_p5 = scmp.ne.s32.totalorder %s2047_s14, %s2043_s13 }
  0xab   : > { %s2330_s30 = scalar_select %p58_p8, %s2051_s15, %s60_s29  }
  0xac   : > { %p2332_p7 = por %p68_p2, %p67_p0  ;;  %p2626_p9 = scmp.eq.s32.totalorder %s2151_s19, 0 }
  0xad   : > { %p270_p4 = scmp.eq.s32.totalorder %s2151_s19, 1  ;;  %p276_p10 = scmp.eq.s32.totalorder %s1356_s23, 1 }
  0xae   : > { %p2338_p6 = por %p2626_p9, %p73_p5  ;;  %p1639_p11 = scmp.lt.s32.totalorder %s2055_s16, 2 }
  0xaf   : > { %s376_s12 = sand.u32 1, %s2051_s15   ;;  %p2345_p1 = por %p270_p4, %p67_p0 }
  0xb0   : > { %p2349_p3 = por %p276_p10, %p73_p5  ;;  %s1365_s21 = sshll.u32 %s376_s12, 3 }
  0xb1   : > { %s2628_s17 = scalar_select %p2345_p1, 1, 0 }
  0xb2   : > { %s2629_s25 = scalar_select %p2349_p3, 1, 0 }
  0xb3   : > { %s1431_s24 = sshll.u32 %s2055_s16, 7  ;;  %s2630_s1 = sld [smem:[#allocation28_spill]] }
  0xb4   : > { %s380_s23 = scalar_lea.vmem [#allocation9], %s1365_s21  ;;  %p2363_p12 = pnand %p1639_p11, %p2332_p7 }
  0xb5   : > { %s387_s29 = sshll.u32 %s380_s23, 4  ;;  %s2370_s18 = scalar_lea.hbm %s2594_s2, %s1431_s24  ;;  %s2359_s29 = int_to_ptr.vmem [resolvable:$true] %s387_s29 }
  0xb6   : > { %s401_s22 = scalar_lea.vmem [#allocation10], %s1365_s21  ;;  %s2374_s4 = scalar_lea.sflag [#allocation6], %s376_s12 }
  0xb7   : > { %s2372_s3 = sshll.u32 %s401_s22, 4  ;;  %p1911_p8 = pneg %p2363_p12  ;;  %s2406_s3 = int_to_ptr.vmem [resolvable:$true] %s2372_s3 }
  0xb9   : > { %s2357_s26 = scalar_lea.hbm %s2630_s1, %s1431_s24  ;;  %s1914_s0 = scalar_lea.hbm %s2630_s1, 256 }
  0xba   : > { %s1909_s23 = scalar_lea.hbm %s2357_s26, 128  ;;  %p1915_p5 = scmp.lt.u32.totalorder %s2357_s26, %s2630_s1 }
  0xbb   : > { %p1910_p13 = scmp.ne.s32.totalorder %s2357_s26, %s1909_s23  ;;  %p1916_p7 = scmp.lt.u32.totalorder %s1914_s0, %s1909_s23 }
  0xbc   : > { %p1918_p4 = scmp.lt.u32.totalorder %s1909_s23, %s2357_s26 }
  0xbd   : > { %p1912_p0 = pnand %p1911_p8, %p1910_p13  ;;  %p1917_p9 = por %p1916_p7, %p1915_p5 }
  0xbf   : > { %p1913_p2 = pneg %p1912_p0  ;;  %p1919_p10 = por %p1918_p4, %p1917_p9 }
  0xc1   : > { %p1920_p11 = pnand %p1919_p10, %p1913_p2 }
  0xc3   : > { %1923 = shalt.err (!%p1920_p11)
}
  0xc4   : > { %s1924_s12 = scalar_lea.vmem %s2359_s29, 128  ;;  %s2067_s5 = smov [#allocation9]  }
  0xc5   : > { %p1925_p13 = scmp.ne.s32.totalorder %s2359_s29, %s1924_s12  ;;  %s1929_s21 = sshll.u32 %s2067_s5, 4  ;;  %s1930_s21 = int_to_ptr.vmem [resolvable:$false] %s1929_s21 }
  0xc6   : > { %s1931_s22 = scalar_lea.vmem %s1930_s21, 256  ;;  %p1932_p1 = scmp.lt.s32.totalorder %s2359_s29, %s1930_s21 }
  0xc7   : > { %p1927_p0 = pnand %p1925_p13, %p1911_p8  ;;  %p1933_p5 = scmp.lt.s32.totalorder %s1931_s22, %s1924_s12 }
  0xc9   : > { %p1928_p3 = pneg %p1927_p0  ;;  %p1934_p7 = por %p1933_p5, %p1932_p1 }
  0xcb   : > { %p1935_p9 = pnand %p1934_p7, %p1928_p3 }
  0xcd   : > { %1938 = shalt.err (!%p1935_p9)
}
  0xce   : > { %s2632_s23 = smov 4   ;;  %s2633_s28 = smov 64  }
  0xcf   : > { %1625 = dma.hbm_to_vmem [thread:$0]  (!%p2363_p12), %s2357_s26, 128, %s2359_s29, %s2374_s4, %s2633_s28, %s2633_s28, %s2632_s23  }
  0xd0   : > { %s397_s0 = sand.u32 1, %s2055_s16   ;;  %s1939_s24 = scalar_lea.hbm %s2370_s18, 128 }
  0xd1   : > { %s2409_s9 = scalar_lea.sflag [#allocation11], %s397_s0  ;;  %p1940_p1 = scmp.ne.s32.totalorder %s2370_s18, %s1939_s24 }
  0xd2   : > { %s1944_s21 = scalar_lea.hbm %s2594_s2, 256  ;;  %p1945_p4 = scmp.lt.u32.totalorder %s2370_s18, %s2594_s2 }
  0xd3   : > { %p1942_p3 = pnand %p1940_p1, %p1911_p8  ;;  %p1946_p10 = scmp.lt.u32.totalorder %s1944_s21, %s1939_s24 }
  0xd4   : > { %p1948_p13 = scmp.lt.u32.totalorder %s1939_s24, %s2370_s18 }
  0xd5   : > { %p1943_p2 = pneg %p1942_p3  ;;  %p1947_p11 = por %p1946_p10, %p1945_p4 }
  0xd7   : > { %p1949_p0 = por %p1948_p13, %p1947_p11 }
  0xd9   : > { %p1950_p5 = pnand %p1949_p0, %p1943_p2 }
  0xdb   : > { %1953 = shalt.err (!%p1950_p5)
}
  0xdc   : > { %s1954_s4 = scalar_lea.vmem %s2406_s3, 128  ;;  %s2068_s26 = smov [#allocation10]  }
  0xdd   : > { %p1955_p7 = scmp.ne.s32.totalorder %s2406_s3, %s1954_s4  ;;  %s1959_s29 = sshll.u32 %s2068_s26, 4  ;;  %s1960_s29 = int_to_ptr.vmem [resolvable:$false] %s1959_s29 }
  0xde   : > { %s1961_s1 = scalar_lea.vmem %s1960_s29, 256  ;;  %p1962_p3 = scmp.lt.s32.totalorder %s2406_s3, %s1960_s29 }
  0xdf   : > { %p1957_p9 = pnand %p1955_p7, %p1911_p8  ;;  %p1963_p4 = scmp.lt.s32.totalorder %s1961_s1, %s1954_s4 }
  0xe1   : > { %p1958_p1 = pneg %p1957_p9  ;;  %p1964_p10 = por %p1963_p4, %p1962_p3 }
  0xe3   : > { %p1965_p11 = pnand %p1964_p10, %p1958_p1 }
  0xe5   : > { %1968 = shalt.err (!%p1965_p11)
}
  0xe6   : > { %1628 = dma.hbm_to_vmem [thread:$0]  (!%p2363_p12), %s2370_s18, 128, %s2406_s3, %s2409_s9, %s2633_s28, %s2633_s28, %s2632_s23  }
  0xe7   : > { %p2634_p8 = scmp.ne.s32.totalorder %s2618_s20, 0 }
  0xe8   : > { %p2635_p2 = scmp.eq.s32.totalorder (!%p2634_p8), %s2151_s19, 0 }
  0xe9   : > { %420 = sbr.rel (%p2634_p8) target bundleno = 1749 (0x6d5), region = 60 }
  0xf0   : > { %2014 = dma.done.wait (%p2635_p2), [#allocation8], 16   ;;  %p2636_p13 = pmov %p2635_p2 }
  0xf1   : > { %s2445_s0 = sand.u32 1, %s2047_s14  }
  0xf2   : > { %2016 = vsyncadd (%p2636_p13), [#allocation8], 4294967280  ;;  %s2448_s10 = sshll.u32 %s2445_s0, 3  ;;  %s427_s24 = scalar_lea.sflag [#allocation6], %s2445_s0 }
  0xf3   : > { %s430_s3 = scalar_lea.vmem [#allocation9], %s2448_s10 }
  0xf4   : > { %2018 = dma.done.wait (%p2338_p6), %s427_s24, 128  }
  0xf5   : > { %2020 = vsyncadd (%p2338_p6), %s427_s24, 4294967168  ;;  %s435_s20 = sand.u32 1, %s2151_s19   ;;  %s439_s23 = scalar_lea.vmem [#allocation10], %s2448_s10 }
  0xf6   : > { %s436_s18 = scalar_lea.sflag [#allocation11], %s435_s20 }
  0xf7   : > { %2022 = dma.done.wait (%p2338_p6), %s436_s18, 128  }
  0xf8   : > { %2024 = vsyncadd (%p2338_p6), %s436_s18, 4294967168  ;;  %p2637_p12 = pmov %p2635_p2 }
  0xf9   : > { %p2638_p0 = pmov %p2635_p2 }
  0xfa   : > { %2026 = dma.done.wait (%p2637_p12), [#allocation11], 256  }
  0xfb   : > { %2028 = vsyncadd (%p2638_p0), [#allocation11], 4294967040  ;;  %p2639_p5 = pmov %p2638_p0 }
  0xfc   : > { %p2640_p7 = pmov %p2638_p0 }
  0xfd   : > { %2030 = dma.done.wait (%p2639_p5), [#allocation14], 2048  }
  0xfe   : > { %2032 = vsyncadd (%p2640_p7), [#allocation14], 4294965248  ;;  %p2641_p9 = pmov %p2638_p0 }
  0xff   : > { %p2642_p1 = pmov %p2638_p0 }
 0x100   : > { %2034 = dma.done.wait (%p2641_p9), [#allocation17], 2048  }
 0x101   : > { %2036 = vsyncadd (%p2642_p1), [#allocation17], 4294965248 }
 0x102   : > { %464 = sfence }
 0x103   : > { %v1696_v0 = vld [vmem:[#allocation13] sm:$0xff]   ;;  %v2069_v1 = vmov 0.0   ;;  %v1697_v2 = vld [vmem:[#allocation13 + $0x8] sm:$0xff]   ;;  %vm2070_vm0 = vmmov 0   ;;  %v1698_v3 = vld [vmem:[#allocation13 + $0x10] sm:$0xff]   ;;  %s1382_s27 = sld [smem:[#allocation5 + $0x2]] }
 0x104   : > { %1481 = vmatprep.subr.bf16.mxu0 %v2069_v1  ;;  %1507 = vmatprep.subr.bf16.mxu1 %v2069_v1  ;;  %v1699_v4 = vld [vmem:[#allocation13 + $0x18] sm:$0xff]   ;;  %v1700_v5 = vld [vmem:[#allocation13 + $0x20] sm:$0xff]   ;;  %v1701_v6 = vld [vmem:[#allocation13 + $0x28] sm:$0xff]   ;;  %vm681_vm1 = vcmask 130048   ;;  %s506_s28 = sld [smem:[#allocation5]]  ;;  %s1381_s12 = sld [smem:[#allocation5 + $0x1]] }
 0x105   : > { %1482 = vmatpush3.bf16.msra.mxu0 %v1696_v0  ;;  %1497 = vmatprep.mubr.msk.bf16.mxu0 %vm2070_vm0, %v2069_v1  ;;  %v1702_v7 = vld [vmem:[#allocation13 + $0x30] sm:$0xff]   ;;  %v1703_v8 = vld [vmem:[#allocation13 + $0x38] sm:$0xff]   ;;  %v1704_v9 = vld [vmem:[%s439_s23] sm:$0xff]   ;;  %vm801_vm2 = vcmask 7168   ;;  %s2643_s26 = sld [smem:[#allocation32_spill]]  ;;  %s501_s29 = scalar_lea.vmem [#allocation19], %s2448_s10 }
 0x106   : > { %1483 = vmatprep.subr.bf16.mxu0 %v2069_v1  ;;  %1509 = vmatprep.mubr.msk.bf16.mxu1 %vm2070_vm0, %v2069_v1  ;;  %v1705_v15 = vld [vmem:[%s430_s3] sm:$0xff]   ;;  %v1706_v35 = vld [vmem:[%s439_s23] sm:$0xff]   ;;  %s1201_s1 = sshll.u32 %s501_s29, 4  ;;  %s1435_s24 = sshll.u32 %s2151_s19, 7  ;;  %s2548_s1 = int_to_ptr.vmem [resolvable:$true] %s1201_s1 }
 0x107   : > { %1508 = vmatpush3.bf16.msra.mxu1 %v1706_v35  ;;  %v624_v38 = vld [vmem:[#allocation12] sm:$0xff]  ;;  %v625_v44 = vld [vmem:[#allocation12 + $0x8] sm:$0xff]  ;;  %s2644_s18 = sld [smem:[#allocation33_spill]]  ;;  %s1188_s10 = scalar_lea.sflag [#allocation7], %s2445_s0 }
 0x108   : > { %1513 = vmatprep.subr.bf16.mxu1 %v2069_v1  ;;  %p2645_p3 = scmp.ne.s32.totalorder %s2628_s17, 0  ;;  %s2072_s19 = smov [#allocation19]  }
 0x109   : > { %1484 = vmatpush3.bf16.msra.mxu0 %v1697_v2  ;;  %v678_v16 = vstv %s1382_s27  ;;  %v1707_v2 = vld [vmem:[#allocation15] sm:$0xff]   ;;  %s1969_s27 = scalar_lea.vmem %s2548_s1, 128 }
 0x10a   : > { %1485 = vmatprep.subr.bf16.mxu0 %v2069_v1  ;;  %s704_s9 = ssub.f32 1.0, %s506_s28  ;;  %v708_v39 = vstv %s506_s28  ;;  %p1970_p6 = scmp.ne.s32.totalorder %s2548_s1, %s1969_s27 }
 0x10b   : > { %v709_v43 = vmul.f32 %v708_v39, %v624_v38  ;;  %v710_v48 = vmul.f32 %v708_v39, %v625_v44  ;;  %s1973_s28 = sshll.u32 %s2072_s19, 4  ;;  %s1974_s28 = int_to_ptr.vmem [resolvable:$false] %s1973_s28 }
 0x10c   : > { %v705_v41 = vstv %s704_s9  ;;  %p1971_p4 = pnand %p1970_p6, %p2645_p3  ;;  %s1975_s9 = scalar_lea.vmem %s1974_s28, 256 }
 0x10d   : > { %1486 = vmatpush3.bf16.msra.mxu0 %v1698_v3  ;;  %v1708_v3 = vld [vmem:[#allocation16] sm:$0xff]   ;;  %s2546_s23 = scalar_lea.hbm %s2644_s18, %s1435_s24  ;;  %p1976_p11 = scmp.lt.s32.totalorder %s2548_s1, %s1974_s28 }
 0x10e   : > { %1487 = vmatprep.subr.bf16.mxu0 %v2069_v1  ;;  %p1972_p10 = pneg %p1971_p4  ;;  %p1977_p8 = scmp.lt.s32.totalorder %s1975_s9, %s1969_s27 }
 0x110   : > { %p1978_p2 = por %p1977_p8, %p1976_p11 }
 0x111   : > { %1488 = vmatpush3.bf16.msra.mxu0 %v1699_v4  ;;  %v1709_v4 = vld [vmem:[#allocation15 + $0x8] sm:$0xff]  }
 0x112   : > { %1489 = vmatprep.subr.bf16.mxu0 %v2069_v1  ;;  %p1979_p13 = pnand %p1978_p2, %p1972_p10 }
 0x115   : > { %1490 = vmatpush3.bf16.msra.mxu0 %v1700_v5  ;;  %v1710_v5 = vld [vmem:[#allocation16 + $0x8] sm:$0xff]  }
 0x116   : > { %1491 = vmatprep.subr.bf16.mxu0 %v2069_v1 }
 0x119   : > { %1492 = vmatpush3.bf16.msra.mxu0 %v1701_v6  ;;  %v1711_v6 = vld [vmem:[#allocation15 + $0x10] sm:$0xff]  }
 0x11a   : > { %1493 = vmatprep.subr.bf16.mxu0 %v2069_v1 }
 0x11d   : > { %1494 = vmatpush3.bf16.msra.mxu0 %v1702_v7  ;;  %v1712_v7 = vld [vmem:[#allocation16 + $0x10] sm:$0xff]  }
 0x11e   : > { %1495 = vmatprep.subr.bf16.mxu0 %v2069_v1 }
 0x121   : > { %1496 = vmatpush3.bf16.msra.mxu0 %v1703_v8  ;;  %v2071_v8 = vmov 0  }
 0x122   : > { %1501 = vmatprep.subr.bf16.mxu0 %v2069_v1  ;;  %1694 = vset.pattern.permute.xlu0 %v2071_v8 }
 0x123   : > { %1695 = vset.pattern.permute.xlu1 %v2071_v8 }
 0x124   : > { %1498 = vmatmul.mubr.bf16.vlgmr.msra.gmra.mrb[0].mxu0 %v1704_v9  ;;  %v1713_v9 = vld [vmem:[#allocation15 + $0x18] sm:$0xff]  }
 0x125   : > { %1503 = vmatprep.mubr.msk.bf16.mxu0 %vm2070_vm0, %v2069_v1 }
 0x1f7   : > { %v615_v10 = vpop.f32.mrb[0].mxu0 }
 0x1f8   : > { %v1499_v11 = vpop.f32.mrb[1].mxu0 }
 0x1f9   : > { %v618_v12 = vpop.f32.mrb[2].mxu0  ;;  %v1715_v11 = vld [vmem:[#allocation15 + $0x20] sm:$0xff]  }
 0x1fa   : > { %v622_v13 = vpack.c.bf16 %v618_v12, %v615_v10  ;;  %v1500_v14 = vpop.f32.mrb[3].mxu0  ;;  %v1714_v10 = vld [vmem:[#allocation16 + $0x18] sm:$0xff]   ;;  %v1716_v12 = vld [vmem:[#allocation16 + $0x20] sm:$0xff]  }
 0x1fb   : > { %v1718_v14 = vld [vmem:[#allocation16 + $0x28] sm:$0xff]  }
 0x1fc   : > { %1502 = vmatpush3.bf16.xpose.msra.mxu0 %v622_v13  ;;  %v1717_v13 = vld [vmem:[#allocation15 + $0x28] sm:$0xff]  }
 0x1fd   : > { %1533 = vmatprep.subr.bf16.mxu0 %v2069_v1 }
 0x203   : > { %1504 = vmatmul.mubr.bf16.vlgmr.msra.gmra.mrb[4].mxu0 %v1705_v15  ;;  %v1719_v15 = vld [vmem:[#allocation15 + $0x30] sm:$0xff]  }
 0x204   : > { %1549 = vmatprep.mubr.msk.bf16.mxu0 %vm2070_vm0, %v2069_v1  ;;  %1534 = vmatpush3.bf16.msra.mxu0 %v1707_v2 }
 0x205   : > { %1535 = vmatprep.subr.bf16.mxu0 %v2069_v1 }
 0x208   : > { %1536 = vmatpush3.bf16.msra.mxu0 %v1709_v4 }
 0x209   : > { %1537 = vmatprep.subr.bf16.mxu0 %v2069_v1 }
 0x20c   : > { %1538 = vmatpush3.bf16.msra.mxu0 %v1711_v6 }
 0x20d   : > { %1539 = vmatprep.subr.bf16.mxu0 %v2069_v1 }
 0x210   : > { %1540 = vmatpush3.bf16.msra.mxu0 %v1713_v9 }
 0x211   : > { %1541 = vmatprep.subr.bf16.mxu0 %v2069_v1 }
 0x214   : > { %1542 = vmatpush3.bf16.msra.mxu0 %v1715_v11 }
 0x215   : > { %1543 = vmatprep.subr.bf16.mxu0 %v2069_v1 }
 0x218   : > { %1544 = vmatpush3.bf16.msra.mxu0 %v1717_v13 }
 0x219   : > { %1545 = vmatprep.subr.bf16.mxu0 %v2069_v1 }
 0x21c   : > { %1546 = vmatpush3.bf16.msra.mxu0 %v1719_v15 }
 0x21d   : > { %1547 = vmatprep.subr.bf16.mxu0 %v2069_v1 }
 0x2d6   : > { %v671_v17 = vpop.f32.mrb[4].mxu0 }
 0x2d7   : > { %v679_v18 = vmul.f32 %v678_v16, %v671_v17  ;;  %v1505_v19 = vpop.f32.mrb[5].mxu0  ;;  %v1721_v17 = vld [vmem:[#allocation15 + $0x38] sm:$0xff]  }
 0x2d8   : > { %v674_v20 = vpop.f32.mrb[6].mxu0  ;;  %1548 = vmatpush3.bf16.msra.mxu0 %v1721_v17  ;;  %v1723_v19 = vld [vmem:[%s430_s3] sm:$0xff]  }
 0x2d9   : > { %v680_v21 = vmul.f32 %v678_v16, %v674_v20  ;;  %v1506_v22 = vpop.f32.mrb[7].mxu0  ;;  %v682_v23 = vsel %vm681_vm1, %v679_v18, -inf  ;;  %v1720_v16 = vld [vmem:[#allocation16 + $0x30] sm:$0xff]   ;;  %v782_v20 = vstv %s1381_s12 }
 0x2da   : > { %683 = vmax.xlane.f32.xlu0 %v682_v23 }
 0x2db   : > { %v685_v24 = vsel %vm681_vm1, %v680_v21, -inf  ;;  %1550 = vmatmul.mubr.bf16.vlgmr.msra.gmra.mrb[8].mxu0 %v1723_v19 }
 0x2de   : > { %686 = vmax.xlane.f32.xlu0 %v685_v24 }
 0x367   : > { %v684_v25 = vpop.xlane.xlu0 %683 }
 0x368   : > { %v688_v26 = vsub.f32 %v679_v18, %v684_v25  ;;  %v1722_v18 = vld [vmem:[#allocation16 + $0x38] sm:$0xff]  }
 0x36a   : > { %v690_v27 = vmul.f32 1.442695, %v688_v26 }
 0x36b   : > { %v687_v28 = vpop.xlane.xlu0 %686 }
 0x36c   : > { %1732 = vpow2.f32 %v690_v27  ;;  %v689_v29 = vsub.f32 %v680_v21, %v687_v28 }
 0x36e   : > { %v692_v30 = vmul.f32 1.442695, %v689_v29 }
 0x370   : > { %1734 = vpow2.f32 %v692_v30 }
 0x376   : > { %v1733_v31 = vpop.eup %1732 }
 0x377   : > { %v694_v32 = vsel %vm681_vm1, %v1733_v31, 0.0 }
 0x378   : > { %695 = vadd.xlane.f32.xlu1 %v694_v32 }
 0x37a   : > { %v1735_v33 = vpop.eup %1734 }
 0x37b   : > { %v697_v34 = vsel %vm681_vm1, %v1735_v33, 0.0 }
 0x37c   : > { %698 = vadd.xlane.f32.xlu1 %v697_v34 }
 0x3ae   : > { %v1016_v44 = vpop.f32.mrb[8].mxu0 }
 0x405   : > { %v696_v36 = vpop.xlane.xlu1 %695 }
 0x406   : > { %1736 = vrcp.f32 %v696_v36 }
 0x409   : > { %v699_v37 = vpop.xlane.xlu1 %698 }
 0x40a   : > { %1738 = vrcp.f32 %v699_v37 }
 0x410   : > { %v1737_v40 = vpop.eup %1736 }
 0x411   : > { %v702_v42 = vmul.f32 %v1737_v40, %v1733_v31 }
 0x413   : > { %v706_v45 = vmul.f32 %v705_v41, %v702_v42 }
 0x414   : > { %v1739_v46 = vpop.eup %1738 }
 0x415   : > { %v703_v47 = vmul.f32 %v1739_v46, %v1735_v33  ;;  %v711_v49 = vadd.f32 %v709_v43, %v706_v45  ;;  %v1551_v45 = vpop.f32.mrb[9].mxu0 }
 0x416   : > { %v1019_v46 = vpop.f32.mrb[10].mxu0 }
 0x417   : > { %v707_v50 = vmul.f32 %v705_v41, %v703_v47  ;;  %v768_v51 = vadd.f32 1e-08, %v711_v49  ;;  %v766_v56 = vsub.f32 0.0, %v711_v49  ;;  %v1552_v47 = vpop.f32.mrb[11].mxu0 }
 0x419   : > { %v712_v52 = vadd.f32 %v710_v48, %v707_v50  ;;  %1740 = vlog2.f32 %v768_v51  ;;  %v1724_v48 = vld [vmem:[#allocation18] sm:$0xff]   ;;  %v1726_v50 = vld [vmem:[#allocation18 + $0x10] sm:$0xff]   ;;  %v1727_v51 = vld [vmem:[#allocation18 + $0x18] sm:$0xff]  }
 0x41b   : > { %v713_v53 = vpack.c.bf16 %v712_v52, %v711_v49  ;;  %v769_v54 = vadd.f32 1e-08, %v712_v52  ;;  %v767_v61 = vsub.f32 0.0, %v712_v52  ;;  %v1725_v49 = vld [vmem:[#allocation18 + $0x8] sm:$0xff]   ;;  %v1728_v52 = vld [vmem:[#allocation18 + $0x20] sm:$0xff]  }
 0x41d   : > { %1510 = vmatmul.mubr.msk.bf16.vlgmr.msra.gmra.mrb[0].mxu1 %vm681_vm1, %v713_v53  ;;  %1742 = vlog2.f32 %v769_v54  ;;  %v1729_v53 = vld [vmem:[#allocation18 + $0x28] sm:$0xff]   ;;  %v1730_v54 = vld [vmem:[#allocation18 + $0x30] sm:$0xff]  }
 0x41e   : > { %1529 = vmatprep.mubr.msk.bf16.mxu1 %vm2070_vm0, %v2069_v1  ;;  %1514 = vmatpush3.bf16.msra.mxu1 %v1708_v3 }
 0x41f   : > { %1515 = vmatprep.subr.bf16.mxu1 %v2069_v1 }
 0x422   : > { %1516 = vmatpush3.bf16.msra.mxu1 %v1710_v5 }
 0x423   : > { %v1741_v55 = vpop.eup %1740  ;;  %1517 = vmatprep.subr.bf16.mxu1 %v2069_v1 }
 0x424   : > { %v771_v57 = vmul.f32 0.6931472, %v1741_v55  ;;  %v1731_v55 = vld [vmem:[#allocation18 + $0x38] sm:$0xff]  }
 0x426   : > { %v774_v58 = vmul.f32 %v771_v57, %v766_v56  ;;  %1518 = vmatpush3.bf16.msra.mxu1 %v1712_v7  ;;  %v1414_v57 = vld [vmem:[%s2599_s7] ss:$0 sm:$0xff] }
 0x427   : > { %v1743_v59 = vpop.eup %1742  ;;  %1519 = vmatprep.subr.bf16.mxu1 %v2069_v1 }
 0x428   : > { %v776_v60 = vsel %vm681_vm1, %v774_v58, 0.0  ;;  %v773_v62 = vmul.f32 0.6931472, %v1743_v59 }
 0x429   : > { %777 = vadd.xlane.f32.xlu0 %v776_v60 }
 0x42a   : > { %v775_v63 = vmul.f32 %v773_v62, %v767_v61  ;;  %1520 = vmatpush3.bf16.msra.mxu1 %v1714_v10 }
 0x42b   : > { %1521 = vmatprep.subr.bf16.mxu1 %v2069_v1 }
 0x42c   : > { %v779_v0 = vsel %vm681_vm1, %v775_v63, 0.0 }
 0x42d   : > { %780 = vadd.xlane.f32.xlu1 %v779_v0 }
 0x42e   : > { %1522 = vmatpush3.bf16.msra.mxu1 %v1716_v12 }
 0x42f   : > { %1523 = vmatprep.subr.bf16.mxu1 %v2069_v1 }
 0x432   : > { %1524 = vmatpush3.bf16.msra.mxu1 %v1718_v14 }
 0x433   : > { %1525 = vmatprep.subr.bf16.mxu1 %v2069_v1 }
 0x436   : > { %1526 = vmatpush3.bf16.msra.mxu1 %v1720_v16 }
 0x437   : > { %1527 = vmatprep.subr.bf16.mxu1 %v2069_v1 }
 0x43a   : > { %1528 = vmatpush3.bf16.msra.mxu1 %v1722_v18 }
 0x43b   : > { %1553 = vmatprep.subr.bf16.mxu1 %v2069_v1 }
 0x4b6   : > { %v778_v21 = vpop.xlane.xlu0 %777 }
 0x4b7   : > { %v783_v22 = vmul.f32 %v782_v20, %v778_v21 }
 0x4b9   : > { %v1395_v23 = vmul.f32 -1.442695, %v783_v22 }
 0x4ba   : > { %v781_v24 = vpop.xlane.xlu1 %780 }
 0x4bb   : > { %1744 = vpow2.f32 %v1395_v23  ;;  %v784_v25 = vmul.f32 %v782_v20, %v781_v24  ;;  %v1415_v20 = vld [vmem:[%s2643_s26] ss:$0 sm:$0xff] }
 0x4bd   : > { %v1396_v26 = vmul.f32 -1.442695, %v784_v25 }
 0x4bf   : > { %1746 = vpow2.f32 %v1396_v26 }
 0x4c5   : > { %v1745_v27 = vpop.eup %1744 }
 0x4c6   : > { %v791_v28 = vadd.f32 1.0, %v1745_v27 }
 0x4c8   : > { %1748 = vrcp.f32 %v791_v28 }
 0x4c9   : > { %v1747_v29 = vpop.eup %1746 }
 0x4ca   : > { %v792_v30 = vadd.f32 1.0, %v1747_v29 }
 0x4cc   : > { %1750 = vrcp.f32 %v792_v30 }
 0x4d2   : > { %v1749_v31 = vpop.eup %1748 }
 0x4d3   : > { %v797_v32 = vsub.f32 1.0, %v1749_v31 }
 0x4d5   : > { %v799_v33 = vmul.f32 2.0, %v797_v32 }
 0x4d6   : > { %v1751_v34 = vpop.eup %1750 }
 0x4d7   : > { %802 = vst.msk [vmem:[#allocation4] sm:$0xff] %vm801_vm2, %v799_v33  ;;  %v798_v35 = vsub.f32 1.0, %v1751_v34 }
 0x4d9   : > { %v800_v36 = vmul.f32 2.0, %v798_v35 }
 0x4db   : > { %803 = vst.msk [vmem:[#allocation4 + $0x8] sm:$0xff] %vm801_vm2, %v800_v36 }
 0x4de   : > { %v1163_v37 = vld [vmem:[#allocation4] sm:$0xff] }
 0x4df   : > { %1167 = vperm.xlu0 %1694, %v1163_v37  }
 0x4e2   : > { %v1164_v38 = vld [vmem:[#allocation4 + $0x8] sm:$0xff] }
 0x4e3   : > { %1172 = vperm.xlu1 %1695, %v1164_v38  }
 0x4f0   : > { %v757_v39 = vpop.f32.mrb[0].mxu1 }
 0x4f1   : > { %v1511_v40 = vpop.f32.mrb[1].mxu1 }
 0x4f2   : > { %v760_v41 = vpop.f32.mrb[2].mxu1 }
 0x4f3   : > { %v764_v42 = vpack.c.bf16 %v760_v41, %v757_v39  ;;  %v1512_v43 = vpop.f32.mrb[3].mxu1 }
 0x4f5   : > { %1530 = vmatmul.mubr.bf16.vlgmr.msra.gmra.mrb[4].mxu1 %v764_v42 }
 0x4f6   : > { %1569 = vmatprep.mubr.msk.bf16.mxu1 %vm2070_vm0, %v2069_v1  ;;  %1554 = vmatpush3.bf16.msra.mxu1 %v1724_v48 }
 0x4f7   : > { %1555 = vmatprep.subr.bf16.mxu1 %v2069_v1 }
 0x4fa   : > { %1556 = vmatpush3.bf16.msra.mxu1 %v1725_v49 }
 0x4fb   : > { %1557 = vmatprep.subr.bf16.mxu1 %v2069_v1 }
 0x4fe   : > { %1558 = vmatpush3.bf16.msra.mxu1 %v1726_v50 }
 0x4ff   : > { %1559 = vmatprep.subr.bf16.mxu1 %v2069_v1 }
 0x502   : > { %1560 = vmatpush3.bf16.msra.mxu1 %v1727_v51 }
 0x503   : > { %1561 = vmatprep.subr.bf16.mxu1 %v2069_v1 }
 0x506   : > { %1562 = vmatpush3.bf16.msra.mxu1 %v1728_v52 }
 0x507   : > { %1563 = vmatprep.subr.bf16.mxu1 %v2069_v1 }
 0x50a   : > { %1564 = vmatpush3.bf16.msra.mxu1 %v1729_v53 }
 0x50b   : > { %1565 = vmatprep.subr.bf16.mxu1 %v2069_v1 }
 0x50e   : > { %1566 = vmatpush3.bf16.msra.mxu1 %v1730_v54 }
 0x50f   : > { %1567 = vmatprep.subr.bf16.mxu1 %v2069_v1 }
 0x512   : > { %1568 = vmatpush3.bf16.msra.mxu1 %v1731_v55 }
 0x55e   : > { %v1168_v27 = vpop.permute.xlu0 %1167 }
 0x562   : > { %v1173_v28 = vpop.permute.xlu1 %1172 }
 0x5c8   : > { %v921_v56 = vpop.f32.mrb[4].mxu1 }
 0x5c9   : > { %v1017_v58 = vadd.f32 %v1016_v44, %v921_v56  ;;  %v1531_v59 = vpop.f32.mrb[5].mxu1 }
 0x5ca   : > { %v924_v60 = vpop.f32.mrb[6].mxu1 }
 0x5cb   : > { %v1030_v61 = vadd.f32 %v1414_v57, %v1017_v58  ;;  %v1020_v62 = vadd.f32 %v1019_v46, %v924_v60  ;;  %v1532_v63 = vpop.f32.mrb[7].mxu1 }
 0x5cd   : > { %v1034_v0 = vmul.f32 %v1030_v61, %v1030_v61  ;;  %v1031_v2 = vadd.f32 %v1414_v57, %v1020_v62  ;;  %v1032_v14 = vmul.f32 0.5, %v1030_v61 }
 0x5cf   : > { %v1036_v3 = vmul.f32 %v1034_v0, %v1030_v61  ;;  %v1035_v4 = vmul.f32 %v1031_v2, %v1031_v2  ;;  %v1033_v15 = vmul.f32 0.5, %v1031_v2 }
 0x5d1   : > { %v1038_v5 = vmul.f32 0.044715, %v1036_v3  ;;  %v1037_v6 = vmul.f32 %v1035_v4, %v1031_v2 }
 0x5d3   : > { %v1040_v7 = vadd.f32 %v1038_v5, %v1030_v61  ;;  %v1039_v1 = vmul.f32 0.044715, %v1037_v6 }
 0x5d5   : > { %v1042_v8 = vmul.f32 0.7978846, %v1040_v7  ;;  %v1041_v9 = vadd.f32 %v1039_v1, %v1031_v2 }
 0x5d7   : > { %1752 = vtanh.f32 %v1042_v8  ;;  %v1043_v10 = vmul.f32 0.7978846, %v1041_v9 }
 0x5d9   : > { %1754 = vtanh.f32 %v1043_v10 }
 0x5e1   : > { %v1753_v11 = vpop.eup %1752 }
 0x5e2   : > { %v1046_v12 = vadd.f32 1.0, %v1753_v11 }
 0x5e3   : > { %v1755_v13 = vpop.eup %1754 }
 0x5e4   : > { %v1047_v16 = vadd.f32 1.0, %v1755_v13  ;;  %v1048_v17 = vmul.f32 %v1046_v12, %v1032_v14 }
 0x5e6   : > { %v1049_v18 = vmul.f32 %v1047_v16, %v1033_v15 }
 0x5e8   : > { %v1050_v19 = vpack.c.bf16 %v1049_v18, %v1048_v17 }
 0x5ea   : > { %1570 = vmatmul.mubr.bf16.vlgmr.msra.gmra.mrb[8].mxu1 %v1050_v19 }
 0x6bd   : > { %v1156_v21 = vpop.f32.mrb[8].mxu1 }
 0x6be   : > { %v1157_v22 = vadd.f32 %v1415_v20, %v1156_v21  ;;  %v1571_v23 = vpop.f32.mrb[9].mxu1 }
 0x6bf   : > { %v1159_v24 = vpop.f32.mrb[10].mxu1 }
 0x6c0   : > { %v1160_v25 = vadd.f32 %v1415_v20, %v1159_v24  ;;  %v1572_v26 = vpop.f32.mrb[11].mxu1  ;;  %v1175_v29 = vmul.f32 %v1168_v27, %v1157_v22 }
 0x6c2   : > { %v1176_v30 = vmul.f32 %v1173_v28, %v1160_v25 }
 0x6c4   : > { %v1439_v31 = vpack.c.bf16 %v1176_v30, %v1175_v29 }
 0x6c6   : > { %1440 = vst [vmem:[%s501_s29] sm:$0xff] %v1439_v31  }
 0x6c7   : > { %1982 = shalt.err (!%p1979_p13)
}
 0x6c8   : > { %s1983_s12 = scalar_lea.hbm %s2546_s23, 128  ;;  %s1987_s22 = scalar_lea.hbm %s2644_s18, 256 }
 0x6c9   : > { %p1984_p12 = scmp.ne.s32.totalorder %s2546_s23, %s1983_s12  ;;  %p1988_p7 = scmp.lt.u32.totalorder %s2546_s23, %s2644_s18 }
 0x6ca   : > { %p1989_p9 = scmp.lt.u32.totalorder %s1987_s22, %s1983_s12  ;;  %p1991_p6 = scmp.lt.u32.totalorder %s1983_s12, %s2546_s23 }
 0x6cb   : > { %p1985_p0 = pnand %p1984_p12, %p2645_p3 }
 0x6cc   : > { %p1990_p1 = por %p1989_p9, %p1988_p7 }
 0x6cd   : > { %p1986_p5 = pneg %p1985_p0 }
 0x6ce   : > { %p1992_p4 = por %p1991_p6, %p1990_p1 }
 0x6d0   : > { %p1993_p10 = pnand %p1992_p4, %p1986_p5 }
 0x6d2   : > { %1996 = shalt.err (!%p1993_p10)
}
 0x6d3   : > { %s2073_s29 = smov 64   ;;  %s2074_s24 = smov 4  }
 0x6d4   : > { %1601 = dma.vmem_to_hbm [thread:$0]  (%p2645_p3), %s2548_s1, 128, %s2546_s23, %s1188_s10, %s2073_s29, %s2073_s29, %s2074_s24  }
 0x6d5 PF: > { %s1216_s3 = sand.u32 1, %s2043_s13   ;;  %p2646_p11 = scmp.ne.s32.totalorder %s2629_s25, 0 }
 0x6d6   : > { %p2647_p8 = scmp.ge.s32.totalorder %s2055_s16, 2  ;;  %s1217_s20 = scalar_lea.sflag [#allocation7], %s1216_s3 }
 0x6d8   : > { %p1630_p2 = pnand %p2647_p8, %p2646_p11 }
 0x6da   : > { %2038 = dma.done.wait (!%p1630_p2), %s1217_s20, 128  }
 0x6db   : > { %2040 = vsyncadd (!%p1630_p2), %s1217_s20, 4294967168  ;;  %p29_p13 = scmp.ge.s32.totalorder %s2319_s11, 4   ;;  %s2648_s13 = smov %s2047_s14 }
 0x6dc   : > { %s2649_s14 = smov %s2051_s15  ;;  %s2650_s15 = smov %s2330_s30 }
 0x6dd   : > { %s2651_s16 = smov %s2319_s11  ;;  %31 = sbr.rel (!%p29_p13) target bundleno = 18 (0x12), region = 143 }
 0x6e4   :  { %1222 = vsyncpa [#allocation6], 1 }
 0x6e5   :  { %1224 = vsyncpa [#allocation6 + $0x1], 1 }
 0x6e6   :  { %1225 = vsyncpa [#allocation11], 1 }
 0x6e7   :  { %1227 = vsyncpa [#allocation11 + $0x1], 1 }
 0x6e8   :  { %1228 = vsyncpa [#allocation14], 1 }
 0x6e9   :  { %1229 = vsyncpa [#allocation17], 1 }
 0x6ea   :  { %1230 = vsyncpa [#allocation7], 1 }
 0x6eb   :  { %1232 = vsyncpa [#allocation7 + $0x1], 1 }
 0x6ec   :  { %1233 = vsyncpa [#allocation8], 1 }
 0x6ed   :  { %1235 = vsyncpa [#allocation8 + $0x1], 1 }

</bundles_post_ra>
